<compile_context>
chip_gen: v7x
topology: tpu7x:2x2x1
jax: 0.10.0
libtpu: 0.0.40
codegen_flags: <defaults>
</compile_context>

<pallas_src>
import functools

import jax
import jax.numpy as jnp
from jax.experimental import pallas as pl
from jax.experimental.pallas import tpu as pltpu

EPS = 1e-5
LEAK = 0.01


def _tap_offsets():
    """Union footprint of the two branches as (dh, dw) offsets around the output pixel.

    Branch 2: 3x3, dilation 3 -> {-3,0,3}^2 (9 taps).  Branch 4: 5x5 -> [-2,2]^2
    (25 taps).  Overlap only at (0,0) => 33 distinct taps.
    """
    b2 = {(dh, dw) for dh in (-3, 0, 3) for dw in (-3, 0, 3)}
    b4 = {(dh, dw) for dh in range(-2, 3) for dw in range(-2, 3)}
    return tuple(sorted(b2 | b4))


def _sk_kernel(x_ref, wf_ref, g_ref, be_ref, cat_ref,
               sum_ref, sumsq_ref, y_ref,
               *, H, W, Cin, inv_n, taps):
    phase = pl.program_id(0)          # 0: conv + batch stats, 1: normalize + store
    b = pl.program_id(1)
    HW = H * W
    PAD = 3 * W + 3                   # flattened-spatial halo, covers |dh| <= 3, |dw| <= 3

    @pl.when(jnp.logical_and(phase == 0, b == 0))
    def _init_stats():
        sum_ref[...] = jnp.zeros_like(sum_ref)
        sumsq_ref[...] = jnp.zeros_like(sumsq_ref)

    @pl.when(phase == 0)
    def _conv_and_stats():
        xb = x_ref[0]                                            # (Cin, H*W) f32
        zpad = jnp.zeros((Cin, PAD), xb.dtype)
        xpf = jnp.concatenate([zpad, xb, zpad], axis=1)          # (Cin, H*W + 2*PAD)

        # Column coordinate (w) of every flattened spatial position, used to mask the
        # horizontal-wrap lanes of shifted taps.
        col = jax.lax.broadcasted_iota(jnp.int32, (1, HW), 1)
        if (W & (W - 1)) == 0:
            col = jnp.bitwise_and(col, W - 1)
        else:
            col = col % W

        # im2col: H*W lane-dense, taps stacked along sublanes -> (33*Cin, H*W).
        slabs = []
        for (dh, dw) in taps:
            off = PAD + dh * W + dw                              # static lane offset
            s = xpf[:, off:off + HW]
            if dw != 0:                                          # zero wrapped columns
                ok = jnp.logical_and(col + dw >= 0, col + dw < W)
                s = jnp.where(ok, s, jnp.zeros_like(s))
            slabs.append(s)
        lhs = jnp.concatenate(slabs, axis=0).astype(jnp.bfloat16)  # (33*Cin, H*W)

        # One bf16 MXU matmul for BOTH branches; rows are already in cat channel order
        # ([x4 ; x2]).  Conv biases omitted: training-mode BN cancels them exactly.
        y = jax.lax.dot_general(wf_ref[...], lhs, (((1,), (0,)), ((), ())),
                                preferred_element_type=jnp.float32)  # (2*Cout, H*W)

        # Per-channel batch statistics (rows of y == cat channels).
        # NOTE: biased variance is later formed as E[y^2] - E[y]^2 in f32.  That is
        # fine for post-conv activations (|mean| ~ std) but would cancel badly if
        # |mean| >> std; switch to a centered second pass if that regime matters.
        sum_ref[...] += jnp.sum(y, axis=1, keepdims=True)
        sumsq_ref[...] += jnp.sum(y * y, axis=1, keepdims=True)

        y_ref[b] = y                       # stash raw activations for phase 1
        cat_ref[0] = y                     # every grid step fully writes its block

    @pl.when(phase == 1)
    def _normalize_and_store():
        mean = sum_ref[...] * inv_n                              # (2*Cout, 1)
        var = sumsq_ref[...] * inv_n - mean * mean               # biased variance
        scale = g_ref[...] * jax.lax.rsqrt(var + EPS)
        shift = be_ref[...] - mean * scale
        yn = y_ref[b] * scale + shift                            # (2*Cout, H*W)
        cat_ref[0] = jnp.where(yn >= 0, yn, LEAK * yn)           # LeakyReLU(0.01)


def _pack_fused_weights(w2, w4, Cin, Cout, taps):
    """(2*Cout, 33*Cin) bf16 weights in cat channel order [branch4 ; branch2].

    Columns are tap-major / channel-minor, matching the in-kernel im2col row order;
    taps a branch does not use are zero.
    """
    wfull = jnp.zeros((7, 7, Cin, 2 * Cout), jnp.float32)
    wfull = wfull.at[1:6, 1:6, :, :Cout].set(w4.astype(jnp.float32))       # 5x5 branch
    for i in range(3):
        for j in range(3):
            wfull = wfull.at[3 * i, 3 * j, :, Cout:].set(
                w2[i, j].astype(jnp.float32))                              # dilated 3x3
    wsel = jnp.stack([wfull[dh + 3, dw + 3] for (dh, dw) in taps], axis=0)  # (T,Cin,2Cout)
    return wsel.reshape(len(taps) * Cin, 2 * Cout).T.astype(jnp.bfloat16)   # (2Cout,T*Cin)


def skconv_block1plus(x_nchw, params):
    """Forward pass of SKConvBlock1plus (training-mode BN). Input NCHW; outputs NCHW."""
    x_nchw = x_nchw.astype(jnp.float32)
    B, Cin, H, W = x_nchw.shape
    Cout = params["w2"].shape[-1]
    HW = H * W
    taps = _tap_offsets()

    # Only wrapper op on x: a free (contiguous minor-dim) reshape.  No transpose/pad.
    x_flat = x_nchw.reshape(B, Cin, HW)

    wf = _pack_fused_weights(params["w2"], params["w4"], Cin, Cout, taps)
    gam = jnp.concatenate([params["g4"], params["g2"]]).reshape(2 * Cout, 1).astype(jnp.float32)
    bet = jnp.concatenate([params["be4"], params["be2"]]).reshape(2 * Cout, 1).astype(jnp.float32)
    # params["b2"] / params["b4"] intentionally unused (training-mode BN cancels them).

    kernel = functools.partial(_sk_kernel, H=H, W=W, Cin=Cin,
                               inv_n=1.0 / float(B * HW), taps=taps)

    def _const_spec(a):
        zeros = (0,) * a.ndim
        return pl.BlockSpec(a.shape, lambda p, b: zeros)

    def _x_index_map(p, b):
        # Phase 1 never reads x: pin phase-1 steps to the already-resident last block
        # so no extra input DMAs are issued during normalization.
        return (b * (1 - p) + (B - 1) * p, 0, 0)

    grid_spec = pltpu.PrefetchScalarGridSpec(
        num_scalar_prefetch=0,
        grid=(2, B),                                   # (phase, image); phase outermost
        in_specs=[
            pl.BlockSpec((1, Cin, HW), _x_index_map),
            _const_spec(wf), _const_spec(gam), _const_spec(bet),
        ],
        # Lane-dense, already NCHW-flattened output; every grid step fully writes
        # block b (phase 0 raw activations, phase 1 final values).
        out_specs=pl.BlockSpec((1, 2 * Cout, HW), lambda p, b: (b, 0, 0)),
        scratch_shapes=[
            pltpu.VMEM((2 * Cout, 1), jnp.float32),       # per-channel sum
            pltpu.VMEM((2 * Cout, 1), jnp.float32),       # per-channel sum of squares
            pltpu.VMEM((B, 2 * Cout, HW), jnp.float32),   # raw conv activation stash
        ],
    )

    # VMEM budget: generous, vreg-padded estimate, clamped to <= 45% of physical VMEM
    # so the same setting is safe on v7x (64 MiB) as well as v5e/v6e (128 MiB).
    def _rup(v, m):
        return ((v + m - 1) // m) * m
    lane_hw = _rup(HW, 128)
    est = (2 * _rup(Cin, 8) * lane_hw * 4                       # x blocks (double-buffered)
           + 2 * _rup(2 * Cout, 8) * lane_hw * 4                # cat blocks
           + 2 * (len(taps) + 1) * _rup(Cin, 8) * lane_hw * 4   # slab + lhs temps
           + B * _rup(2 * Cout, 8) * lane_hw * 4                # activation stash
           + (1 << 20))
    try:
        phys = pltpu.get_tpu_info().vmem_capacity_bytes
    except Exception:                                  # conservative default: v7x per-core
        phys = 64 * 2 ** 20
    vmem_limit = int(min(max(2 * est, 8 * 2 ** 20), int(0.45 * phys)))

    flops = 2 * B * HW * (2 * Cout) * (len(taps) * Cin)         # conv matmul, phase 0 only
    bytes_accessed = int(4 * x_flat.size + 2 * wf.size + 4 * (gam.size + bet.size)
                         + 2 * 4 * B * 2 * Cout * HW)           # cat written in both phases

    cat3 = pl.pallas_call(
        kernel,
        out_shape=jax.ShapeDtypeStruct((B, 2 * Cout, HW), jnp.float32),
        grid_spec=grid_spec,
        compiler_params=pltpu.CompilerParams(
            dimension_semantics=("arbitrary", "arbitrary"),
            vmem_limit_bytes=vmem_limit),
        cost_estimate=pl.CostEstimate(flops=flops, transcendentals=2 * Cout * B,
                                      bytes_accessed=bytes_accessed),
    )(x_flat, wf, gam, bet)

    cat = cat3.reshape(B, 2 * Cout, H, W)              # free reshape, already NCHW
    x4 = cat[:, :Cout]
    x2 = cat[:, Cout:]
    return cat, x2, x4


def _reference(x_nchw, params):
    """Pure-JAX reference (lax convs, with bias) for correctness checking."""
    x = jnp.transpose(x_nchw, (0, 2, 3, 1)).astype(jnp.float32)
    dn = ("NHWC", "HWIO", "NHWC")
    y2 = jax.lax.conv_general_dilated(
        x, params["w2"], (1, 1), [(3, 3), (3, 3)],
        rhs_dilation=(3, 3), dimension_numbers=dn) + params["b2"]
    y4 = jax.lax.conv_general_dilated(
        x, params["w4"], (1, 1), [(2, 2), (2, 2)],
        dimension_numbers=dn) + params["b4"]

    def bn_act(y, g, b):
        m = y.mean(axis=(0, 1, 2))
        v = ((y - m) ** 2).mean(axis=(0, 1, 2))
        yn = (y - m) / jnp.sqrt(v + EPS) * g + b
        return jnp.where(yn >= 0, yn, LEAK * yn)

    x2 = bn_act(y2, params["g2"], params["be2"])
    x4 = bn_act(y4, params["g4"], params["be4"])
    cat = jnp.concatenate([x4, x2], axis=-1)
    to_nchw = lambda t: jnp.transpose(t, (0, 3, 1, 2))
    return to_nchw(cat), to_nchw(x2), to_nchw(x4)


def _init_params(key, in_channels, out_channels):
    ks = jax.random.split(key, 8)
    return {
        # conv weights stored directly as (KH, KW, Cin, Cout)
        "w2": 0.2 * jax.random.normal(ks[0], (3, 3, in_channels, out_channels), jnp.float32),
        "b2": 0.1 * jax.random.normal(ks[1], (out_channels,), jnp.float32),
        "w4": 0.1 * jax.random.normal(ks[2], (5, 5, in_channels, out_channels), jnp.float32),
        "b4": 0.1 * jax.random.normal(ks[3], (out_channels,), jnp.float32),
        "g2": 1.0 + 0.1 * jax.random.normal(ks[4], (out_channels,), jnp.float32),
        "be2": 0.1 * jax.random.normal(ks[5], (out_channels,), jnp.float32),
        "g4": 1.0 + 0.1 * jax.random.normal(ks[6], (out_channels,), jnp.float32),
        "be4": 0.1 * jax.random.normal(ks[7], (out_channels,), jnp.float32),
    }


if __name__ == "__main__":
    key = jax.random.PRNGKey(0)
    kx, kp = jax.random.split(key)

    B, Cin, Cout, H, W = 2, 4, 8, 16, 16
    x = jax.random.normal(kx, (B, Cin, H, W), jnp.float32)   # NCHW, like PyTorch
    params = _init_params(kp, Cin, Cout)

    fwd = jax.jit(skconv_block1plus)
    cat, x2, x4 = fwd(x, params)
    jax.block_until_ready((cat, x2, x4))

    ref_cat, ref_x2, ref_x4 = _reference(x, params)
    assert cat.shape == (B, 2 * Cout, H, W)
    assert x2.shape == (B, Cout, H, W) and x4.shape == (B, Cout, H, W)
    # bf16 MXU operands -> ~1e-2-level absolute error on the unit-variance BN outputs.
    TOL = dict(atol=3e-2, rtol=3e-2)
    assert jnp.allclose(cat, ref_cat, **TOL)
    assert jnp.allclose(x2, ref_x2, **TOL)
    assert jnp.allclose(x4, ref_x4, **TOL)

    print("KERNEL_OK")
</pallas_src>

<mosaic_0001>
module attributes {stable_mosaic.version = 11 : i64} {
  func.func @_sk_kernel(%arg0: i32, %arg1: i32, %arg2: memref<1x4x256xf32, #tpu.memory_space<vmem>>, %arg3: memref<16x132xbf16, #tpu.memory_space<vmem>>, %arg4: memref<16x1xf32, #tpu.memory_space<vmem>>, %arg5: memref<16x1xf32, #tpu.memory_space<vmem>>, %arg6: memref<1x16x256xf32, #tpu.memory_space<vmem>>, %arg7: memref<16x1xf32, #tpu.memory_space<vmem>>, %arg8: memref<16x1xf32, #tpu.memory_space<vmem>>, %arg9: memref<2x16x256xf32, #tpu.memory_space<vmem>>) attributes {dimension_semantics = [#tpu.dimension_semantics<arbitrary>, #tpu.dimension_semantics<arbitrary>], iteration_bounds = array<i64: 2, 2>, scalar_prefetch = 0 : i64, scratch_operands = 3 : i64, tpu.core_type = #tpu.core_type<tc>, window_params = [{transform_indices = @transform_0, window_bounds = array<i64: 1, 4, 256>}, {pipeline_mode = #tpu.pipeline_mode<synchronous>, transform_indices = @transform_1, window_bounds = array<i64: 16, 132>}, {pipeline_mode = #tpu.pipeline_mode<synchronous>, transform_indices = @transform_2, window_bounds = array<i64: 16, 1>}, {pipeline_mode = #tpu.pipeline_mode<synchronous>, transform_indices = @transform_3, window_bounds = array<i64: 16, 1>}, {transform_indices = @transform_4, window_bounds = array<i64: 1, 16, 256>}]} {
    %c0_i32 = arith.constant 0 : i32
    %0 = arith.cmpi eq, %arg0, %c0_i32 : i32
    %c0_i32_0 = arith.constant 0 : i32
    %1 = arith.cmpi eq, %arg1, %c0_i32_0 : i32
    %2 = arith.andi %0, %1 : i1
    %3 = arith.extui %2 : i1 to i32
    %c0_i32_1 = arith.constant 0 : i32
    %4 = arith.cmpi ne, %3, %c0_i32_1 : i32
    scf.if %4 {
      %cst = arith.constant 0.000000e+00 : f32
      %11 = vector.broadcast %cst : f32 to vector<16x1xf32>
      %c0 = arith.constant 0 : index
      %c0_5 = arith.constant 0 : index
      %12 = vector.load %arg7[%c0, %c0_5] : memref<16x1xf32, #tpu.memory_space<vmem>>, vector<16x1xf32>
      tpu.vector_store %arg7[%c0, %c0_5], %11 {strides = array<i32>} : memref<16x1xf32, #tpu.memory_space<vmem>>, vector<16x1xf32>,
      %cst_6 = arith.constant 0.000000e+00 : f32
      %13 = vector.broadcast %cst_6 : f32 to vector<16x1xf32>
      %c0_7 = arith.constant 0 : index
      %c0_8 = arith.constant 0 : index
      %14 = vector.load %arg8[%c0_7, %c0_8] : memref<16x1xf32, #tpu.memory_space<vmem>>, vector<16x1xf32>
      tpu.vector_store %arg8[%c0_7, %c0_8], %13 {strides = array<i32>} : memref<16x1xf32, #tpu.memory_space<vmem>>, vector<16x1xf32>,
    } else {
    }
    %c0_i32_2 = arith.constant 0 : i32
    %5 = arith.cmpi eq, %arg0, %c0_i32_2 : i32
    %6 = arith.extui %5 : i1 to i32
    %c0_i32_3 = arith.constant 0 : i32
    %7 = arith.cmpi ne, %6, %c0_i32_3 : i32
    scf.if %7 {
      %c0 = arith.constant 0 : index
      %c0_5 = arith.constant 0 : index
      %c0_6 = arith.constant 0 : index
      %11 = vector.load %arg2[%c0, %c0_5, %c0_6] : memref<1x4x256xf32, #tpu.memory_space<vmem>>, vector<1x4x256xf32>
      %12 = vector.shape_cast %11 : vector<1x4x256xf32> to vector<4x256xf32>
      %cst = arith.constant 0.000000e+00 : f32
      %13 = vector.broadcast %cst : f32 to vector<4x51xf32>
      %14 = tpu.concatenate %13, %12, %13 in 1 : vector<4x51xf32>, vector<4x256xf32>, vector<4x51xf32> -> vector<4x358xf32>
      %15 = tpu.iota {dimensions = array<i32: 1>} : vector<1x256xi32>
      %c15_i32 = arith.constant 15 : i32
      %16 = vector.broadcast %c15_i32 : i32 to vector<1x256xi32>
      %17 = arith.andi %15, %16 : vector<1x256xi32>
      %18 = vector.extract_strided_slice %14 {offsets = [0, 0], sizes = [4, 256], strides = [1, 1]} : vector<4x358xf32> to vector<4x256xf32>
      %c-3_i32 = arith.constant -3 : i32
      %19 = vector.broadcast %c-3_i32 : i32 to vector<1x256xi32>
      %20 = arith.addi %17, %19 : vector<1x256xi32>
      %c0_i32_7 = arith.constant 0 : i32
      %21 = vector.broadcast %c0_i32_7 : i32 to vector<1x256xi32>
      %22 = arith.cmpi sge, %20, %21 : vector<1x256xi32>
      %c-3_i32_8 = arith.constant -3 : i32
      %23 = vector.broadcast %c-3_i32_8 : i32 to vector<1x256xi32>
      %24 = arith.addi %17, %23 : vector<1x256xi32>
      %c16_i32 = arith.constant 16 : i32
      %25 = vector.broadcast %c16_i32 : i32 to vector<1x256xi32>
      %26 = arith.cmpi slt, %24, %25 : vector<1x256xi32>
      %27 = arith.andi %22, %26 : vector<1x256xi1>
      %cst_9 = arith.constant 0.000000e+00 : f32
      %28 = vector.broadcast %cst_9 : f32 to vector<4x256xf32>
      %29 = vector.shape_cast %27 : vector<1x256xi1> to vector<1x256xi1>
      %30 = vector.broadcast %29 : vector<1x256xi1> to vector<4x256xi1>
      %31 = arith.select %30, %18, %28 : vector<4x256xi1>, vector<4x256xf32>
      %32 = vector.extract_strided_slice %14 {offsets = [0, 3], sizes = [4, 256], strides = [1, 1]} : vector<4x358xf32> to vector<4x256xf32>
      %33 = vector.extract_strided_slice %14 {offsets = [0, 6], sizes = [4, 256], strides = [1, 1]} : vector<4x358xf32> to vector<4x256xf32>
      %c3_i32 = arith.constant 3 : i32
      %34 = vector.broadcast %c3_i32 : i32 to vector<1x256xi32>
      %35 = arith.addi %17, %34 : vector<1x256xi32>
      %c0_i32_10 = arith.constant 0 : i32
      %36 = vector.broadcast %c0_i32_10 : i32 to vector<1x256xi32>
      %37 = arith.cmpi sge, %35, %36 : vector<1x256xi32>
      %c3_i32_11 = arith.constant 3 : i32
      %38 = vector.broadcast %c3_i32_11 : i32 to vector<1x256xi32>
      %39 = arith.addi %17, %38 : vector<1x256xi32>
      %c16_i32_12 = arith.constant 16 : i32
      %40 = vector.broadcast %c16_i32_12 : i32 to vector<1x256xi32>
      %41 = arith.cmpi slt, %39, %40 : vector<1x256xi32>
      %42 = arith.andi %37, %41 : vector<1x256xi1>
      %cst_13 = arith.constant 0.000000e+00 : f32
      %43 = vector.broadcast %cst_13 : f32 to vector<4x256xf32>
      %44 = vector.shape_cast %42 : vector<1x256xi1> to vector<1x256xi1>
      %45 = vector.broadcast %44 : vector<1x256xi1> to vector<4x256xi1>
      %46 = arith.select %45, %33, %43 : vector<4x256xi1>, vector<4x256xf32>
      %47 = vector.extract_strided_slice %14 {offsets = [0, 17], sizes = [4, 256], strides = [1, 1]} : vector<4x358xf32> to vector<4x256xf32>
      %c-2_i32 = arith.constant -2 : i32
      %48 = vector.broadcast %c-2_i32 : i32 to vector<1x256xi32>
      %49 = arith.addi %17, %48 : vector<1x256xi32>
      %c0_i32_14 = arith.constant 0 : i32
      %50 = vector.broadcast %c0_i32_14 : i32 to vector<1x256xi32>
      %51 = arith.cmpi sge, %49, %50 : vector<1x256xi32>
      %c-2_i32_15 = arith.constant -2 : i32
      %52 = vector.broadcast %c-2_i32_15 : i32 to vector<1x256xi32>
      %53 = arith.addi %17, %52 : vector<1x256xi32>
      %c16_i32_16 = arith.constant 16 : i32
      %54 = vector.broadcast %c16_i32_16 : i32 to vector<1x256xi32>
      %55 = arith.cmpi slt, %53, %54 : vector<1x256xi32>
      %56 = arith.andi %51, %55 : vector<1x256xi1>
      %cst_17 = arith.constant 0.000000e+00 : f32
      %57 = vector.broadcast %cst_17 : f32 to vector<4x256xf32>
      %58 = vector.shape_cast %56 : vector<1x256xi1> to vector<1x256xi1>
      %59 = vector.broadcast %58 : vector<1x256xi1> to vector<4x256xi1>
      %60 = arith.select %59, %47, %57 : vector<4x256xi1>, vector<4x256xf32>
      %61 = vector.extract_strided_slice %14 {offsets = [0, 18], sizes = [4, 256], strides = [1, 1]} : vector<4x358xf32> to vector<4x256xf32>
      %c-1_i32 = arith.constant -1 : i32
      %62 = vector.broadcast %c-1_i32 : i32 to vector<1x256xi32>
      %63 = arith.addi %17, %62 : vector<1x256xi32>
      %c0_i32_18 = arith.constant 0 : i32
      %64 = vector.broadcast %c0_i32_18 : i32 to vector<1x256xi32>
      %65 = arith.cmpi sge, %63, %64 : vector<1x256xi32>
      %c-1_i32_19 = arith.constant -1 : i32
      %66 = vector.broadcast %c-1_i32_19 : i32 to vector<1x256xi32>
      %67 = arith.addi %17, %66 : vector<1x256xi32>
      %c16_i32_20 = arith.constant 16 : i32
      %68 = vector.broadcast %c16_i32_20 : i32 to vector<1x256xi32>
      %69 = arith.cmpi slt, %67, %68 : vector<1x256xi32>
      %70 = arith.andi %65, %69 : vector<1x256xi1>
      %cst_21 = arith.constant 0.000000e+00 : f32
      %71 = vector.broadcast %cst_21 : f32 to vector<4x256xf32>
      %72 = vector.shape_cast %70 : vector<1x256xi1> to vector<1x256xi1>
      %73 = vector.broadcast %72 : vector<1x256xi1> to vector<4x256xi1>
      %74 = arith.select %73, %61, %71 : vector<4x256xi1>, vector<4x256xf32>
      %75 = vector.extract_strided_slice %14 {offsets = [0, 19], sizes = [4, 256], strides = [1, 1]} : vector<4x358xf32> to vector<4x256xf32>
      %76 = vector.extract_strided_slice %14 {offsets = [0, 20], sizes = [4, 256], strides = [1, 1]} : vector<4x358xf32> to vector<4x256xf32>
      %c1_i32_22 = arith.constant 1 : i32
      %77 = vector.broadcast %c1_i32_22 : i32 to vector<1x256xi32>
      %78 = arith.addi %17, %77 : vector<1x256xi32>
      %c0_i32_23 = arith.constant 0 : i32
      %79 = vector.broadcast %c0_i32_23 : i32 to vector<1x256xi32>
      %80 = arith.cmpi sge, %78, %79 : vector<1x256xi32>
      %c1_i32_24 = arith.constant 1 : i32
      %81 = vector.broadcast %c1_i32_24 : i32 to vector<1x256xi32>
      %82 = arith.addi %17, %81 : vector<1x256xi32>
      %c16_i32_25 = arith.constant 16 : i32
      %83 = vector.broadcast %c16_i32_25 : i32 to vector<1x256xi32>
      %84 = arith.cmpi slt, %82, %83 : vector<1x256xi32>
      %85 = arith.andi %80, %84 : vector<1x256xi1>
      %cst_26 = arith.constant 0.000000e+00 : f32
      %86 = vector.broadcast %cst_26 : f32 to vector<4x256xf32>
      %87 = vector.shape_cast %85 : vector<1x256xi1> to vector<1x256xi1>
      %88 = vector.broadcast %87 : vector<1x256xi1> to vector<4x256xi1>
      %89 = arith.select %88, %76, %86 : vector<4x256xi1>, vector<4x256xf32>
      %90 = vector.extract_strided_slice %14 {offsets = [0, 21], sizes = [4, 256], strides = [1, 1]} : vector<4x358xf32> to vector<4x256xf32>
      %c2_i32 = arith.constant 2 : i32
      %91 = vector.broadcast %c2_i32 : i32 to vector<1x256xi32>
      %92 = arith.addi %17, %91 : vector<1x256xi32>
      %c0_i32_27 = arith.constant 0 : i32
      %93 = vector.broadcast %c0_i32_27 : i32 to vector<1x256xi32>
      %94 = arith.cmpi sge, %92, %93 : vector<1x256xi32>
      %c2_i32_28 = arith.constant 2 : i32
      %95 = vector.broadcast %c2_i32_28 : i32 to vector<1x256xi32>
      %96 = arith.addi %17, %95 : vector<1x256xi32>
      %c16_i32_29 = arith.constant 16 : i32
      %97 = vector.broadcast %c16_i32_29 : i32 to vector<1x256xi32>
      %98 = arith.cmpi slt, %96, %97 : vector<1x256xi32>
      %99 = arith.andi %94, %98 : vector<1x256xi1>
      %cst_30 = arith.constant 0.000000e+00 : f32
      %100 = vector.broadcast %cst_30 : f32 to vector<4x256xf32>
      %101 = vector.shape_cast %99 : vector<1x256xi1> to vector<1x256xi1>
      %102 = vector.broadcast %101 : vector<1x256xi1> to vector<4x256xi1>
      %103 = arith.select %102, %90, %100 : vector<4x256xi1>, vector<4x256xf32>
      %104 = vector.extract_strided_slice %14 {offsets = [0, 33], sizes = [4, 256], strides = [1, 1]} : vector<4x358xf32> to vector<4x256xf32>
      %c-2_i32_31 = arith.constant -2 : i32
      %105 = vector.broadcast %c-2_i32_31 : i32 to vector<1x256xi32>
      %106 = arith.addi %17, %105 : vector<1x256xi32>
      %c0_i32_32 = arith.constant 0 : i32
      %107 = vector.broadcast %c0_i32_32 : i32 to vector<1x256xi32>
      %108 = arith.cmpi sge, %106, %107 : vector<1x256xi32>
      %c-2_i32_33 = arith.constant -2 : i32
      %109 = vector.broadcast %c-2_i32_33 : i32 to vector<1x256xi32>
      %110 = arith.addi %17, %109 : vector<1x256xi32>
      %c16_i32_34 = arith.constant 16 : i32
      %111 = vector.broadcast %c16_i32_34 : i32 to vector<1x256xi32>
      %112 = arith.cmpi slt, %110, %111 : vector<1x256xi32>
      %113 = arith.andi %108, %112 : vector<1x256xi1>
      %cst_35 = arith.constant 0.000000e+00 : f32
      %114 = vector.broadcast %cst_35 : f32 to vector<4x256xf32>
      %115 = vector.shape_cast %113 : vector<1x256xi1> to vector<1x256xi1>
      %116 = vector.broadcast %115 : vector<1x256xi1> to vector<4x256xi1>
      %117 = arith.select %116, %104, %114 : vector<4x256xi1>, vector<4x256xf32>
      %118 = vector.extract_strided_slice %14 {offsets = [0, 34], sizes = [4, 256], strides = [1, 1]} : vector<4x358xf32> to vector<4x256xf32>
      %c-1_i32_36 = arith.constant -1 : i32
      %119 = vector.broadcast %c-1_i32_36 : i32 to vector<1x256xi32>
      %120 = arith.addi %17, %119 : vector<1x256xi32>
      %c0_i32_37 = arith.constant 0 : i32
      %121 = vector.broadcast %c0_i32_37 : i32 to vector<1x256xi32>
      %122 = arith.cmpi sge, %120, %121 : vector<1x256xi32>
      %c-1_i32_38 = arith.constant -1 : i32
      %123 = vector.broadcast %c-1_i32_38 : i32 to vector<1x256xi32>
      %124 = arith.addi %17, %123 : vector<1x256xi32>
      %c16_i32_39 = arith.constant 16 : i32
      %125 = vector.broadcast %c16_i32_39 : i32 to vector<1x256xi32>
      %126 = arith.cmpi slt, %124, %125 : vector<1x256xi32>
      %127 = arith.andi %122, %126 : vector<1x256xi1>
      %cst_40 = arith.constant 0.000000e+00 : f32
      %128 = vector.broadcast %cst_40 : f32 to vector<4x256xf32>
      %129 = vector.shape_cast %127 : vector<1x256xi1> to vector<1x256xi1>
      %130 = vector.broadcast %129 : vector<1x256xi1> to vector<4x256xi1>
      %131 = arith.select %130, %118, %128 : vector<4x256xi1>, vector<4x256xf32>
      %132 = vector.extract_strided_slice %14 {offsets = [0, 35], sizes = [4, 256], strides = [1, 1]} : vector<4x358xf32> to vector<4x256xf32>
      %133 = vector.extract_strided_slice %14 {offsets = [0, 36], sizes = [4, 256], strides = [1, 1]} : vector<4x358xf32> to vector<4x256xf32>
      %c1_i32_41 = arith.constant 1 : i32
      %134 = vector.broadcast %c1_i32_41 : i32 to vector<1x256xi32>
      %135 = arith.addi %17, %134 : vector<1x256xi32>
      %c0_i32_42 = arith.constant 0 : i32
      %136 = vector.broadcast %c0_i32_42 : i32 to vector<1x256xi32>
      %137 = arith.cmpi sge, %135, %136 : vector<1x256xi32>
      %c1_i32_43 = arith.constant 1 : i32
      %138 = vector.broadcast %c1_i32_43 : i32 to vector<1x256xi32>
      %139 = arith.addi %17, %138 : vector<1x256xi32>
      %c16_i32_44 = arith.constant 16 : i32
      %140 = vector.broadcast %c16_i32_44 : i32 to vector<1x256xi32>
      %141 = arith.cmpi slt, %139, %140 : vector<1x256xi32>
      %142 = arith.andi %137, %141 : vector<1x256xi1>
      %cst_45 = arith.constant 0.000000e+00 : f32
      %143 = vector.broadcast %cst_45 : f32 to vector<4x256xf32>
      %144 = vector.shape_cast %142 : vector<1x256xi1> to vector<1x256xi1>
      %145 = vector.broadcast %144 : vector<1x256xi1> to vector<4x256xi1>
      %146 = arith.select %145, %133, %143 : vector<4x256xi1>, vector<4x256xf32>
      %147 = vector.extract_strided_slice %14 {offsets = [0, 37], sizes = [4, 256], strides = [1, 1]} : vector<4x358xf32> to vector<4x256xf32>
      %c2_i32_46 = arith.constant 2 : i32
      %148 = vector.broadcast %c2_i32_46 : i32 to vector<1x256xi32>
      %149 = arith.addi %17, %148 : vector<1x256xi32>
      %c0_i32_47 = arith.constant 0 : i32
      %150 = vector.broadcast %c0_i32_47 : i32 to vector<1x256xi32>
      %151 = arith.cmpi sge, %149, %150 : vector<1x256xi32>
      %c2_i32_48 = arith.constant 2 : i32
      %152 = vector.broadcast %c2_i32_48 : i32 to vector<1x256xi32>
      %153 = arith.addi %17, %152 : vector<1x256xi32>
      %c16_i32_49 = arith.constant 16 : i32
      %154 = vector.broadcast %c16_i32_49 : i32 to vector<1x256xi32>
      %155 = arith.cmpi slt, %153, %154 : vector<1x256xi32>
      %156 = arith.andi %151, %155 : vector<1x256xi1>
      %cst_50 = arith.constant 0.000000e+00 : f32
      %157 = vector.broadcast %cst_50 : f32 to vector<4x256xf32>
      %158 = vector.shape_cast %156 : vector<1x256xi1> to vector<1x256xi1>
      %159 = vector.broadcast %158 : vector<1x256xi1> to vector<4x256xi1>
      %160 = arith.select %159, %147, %157 : vector<4x256xi1>, vector<4x256xf32>
      %161 = vector.extract_strided_slice %14 {offsets = [0, 48], sizes = [4, 256], strides = [1, 1]} : vector<4x358xf32> to vector<4x256xf32>
      %c-3_i32_51 = arith.constant -3 : i32
      %162 = vector.broadcast %c-3_i32_51 : i32 to vector<1x256xi32>
      %163 = arith.addi %17, %162 : vector<1x256xi32>
      %c0_i32_52 = arith.constant 0 : i32
      %164 = vector.broadcast %c0_i32_52 : i32 to vector<1x256xi32>
      %165 = arith.cmpi sge, %163, %164 : vector<1x256xi32>
      %c-3_i32_53 = arith.constant -3 : i32
      %166 = vector.broadcast %c-3_i32_53 : i32 to vector<1x256xi32>
      %167 = arith.addi %17, %166 : vector<1x256xi32>
      %c16_i32_54 = arith.constant 16 : i32
      %168 = vector.broadcast %c16_i32_54 : i32 to vector<1x256xi32>
      %169 = arith.cmpi slt, %167, %168 : vector<1x256xi32>
      %170 = arith.andi %165, %169 : vector<1x256xi1>
      %cst_55 = arith.constant 0.000000e+00 : f32
      %171 = vector.broadcast %cst_55 : f32 to vector<4x256xf32>
      %172 = vector.shape_cast %170 : vector<1x256xi1> to vector<1x256xi1>
      %173 = vector.broadcast %172 : vector<1x256xi1> to vector<4x256xi1>
      %174 = arith.select %173, %161, %171 : vector<4x256xi1>, vector<4x256xf32>
      %175 = vector.extract_strided_slice %14 {offsets = [0, 49], sizes = [4, 256], strides = [1, 1]} : vector<4x358xf32> to vector<4x256xf32>
      %c-2_i32_56 = arith.constant -2 : i32
      %176 = vector.broadcast %c-2_i32_56 : i32 to vector<1x256xi32>
      %177 = arith.addi %17, %176 : vector<1x256xi32>
      %c0_i32_57 = arith.constant 0 : i32
      %178 = vector.broadcast %c0_i32_57 : i32 to vector<1x256xi32>
      %179 = arith.cmpi sge, %177, %178 : vector<1x256xi32>
      %c-2_i32_58 = arith.constant -2 : i32
      %180 = vector.broadcast %c-2_i32_58 : i32 to vector<1x256xi32>
      %181 = arith.addi %17, %180 : vector<1x256xi32>
      %c16_i32_59 = arith.constant 16 : i32
      %182 = vector.broadcast %c16_i32_59 : i32 to vector<1x256xi32>
      %183 = arith.cmpi slt, %181, %182 : vector<1x256xi32>
      %184 = arith.andi %179, %183 : vector<1x256xi1>
      %cst_60 = arith.constant 0.000000e+00 : f32
      %185 = vector.broadcast %cst_60 : f32 to vector<4x256xf32>
      %186 = vector.shape_cast %184 : vector<1x256xi1> to vector<1x256xi1>
      %187 = vector.broadcast %186 : vector<1x256xi1> to vector<4x256xi1>
      %188 = arith.select %187, %175, %185 : vector<4x256xi1>, vector<4x256xf32>
      %189 = vector.extract_strided_slice %14 {offsets = [0, 50], sizes = [4, 256], strides = [1, 1]} : vector<4x358xf32> to vector<4x256xf32>
      %c-1_i32_61 = arith.constant -1 : i32
      %190 = vector.broadcast %c-1_i32_61 : i32 to vector<1x256xi32>
      %191 = arith.addi %17, %190 : vector<1x256xi32>
      %c0_i32_62 = arith.constant 0 : i32
      %192 = vector.broadcast %c0_i32_62 : i32 to vector<1x256xi32>
      %193 = arith.cmpi sge, %191, %192 : vector<1x256xi32>
      %c-1_i32_63 = arith.constant -1 : i32
      %194 = vector.broadcast %c-1_i32_63 : i32 to vector<1x256xi32>
      %195 = arith.addi %17, %194 : vector<1x256xi32>
      %c16_i32_64 = arith.constant 16 : i32
      %196 = vector.broadcast %c16_i32_64 : i32 to vector<1x256xi32>
      %197 = arith.cmpi slt, %195, %196 : vector<1x256xi32>
      %198 = arith.andi %193, %197 : vector<1x256xi1>
      %cst_65 = arith.constant 0.000000e+00 : f32
      %199 = vector.broadcast %cst_65 : f32 to vector<4x256xf32>
      %200 = vector.shape_cast %198 : vector<1x256xi1> to vector<1x256xi1>
      %201 = vector.broadcast %200 : vector<1x256xi1> to vector<4x256xi1>
      %202 = arith.select %201, %189, %199 : vector<4x256xi1>, vector<4x256xf32>
      %203 = vector.extract_strided_slice %14 {offsets = [0, 51], sizes = [4, 256], strides = [1, 1]} : vector<4x358xf32> to vector<4x256xf32>
      %204 = vector.extract_strided_slice %14 {offsets = [0, 52], sizes = [4, 256], strides = [1, 1]} : vector<4x358xf32> to vector<4x256xf32>
      %c1_i32_66 = arith.constant 1 : i32
      %205 = vector.broadcast %c1_i32_66 : i32 to vector<1x256xi32>
      %206 = arith.addi %17, %205 : vector<1x256xi32>
      %c0_i32_67 = arith.constant 0 : i32
      %207 = vector.broadcast %c0_i32_67 : i32 to vector<1x256xi32>
      %208 = arith.cmpi sge, %206, %207 : vector<1x256xi32>
      %c1_i32_68 = arith.constant 1 : i32
      %209 = vector.broadcast %c1_i32_68 : i32 to vector<1x256xi32>
      %210 = arith.addi %17, %209 : vector<1x256xi32>
      %c16_i32_69 = arith.constant 16 : i32
      %211 = vector.broadcast %c16_i32_69 : i32 to vector<1x256xi32>
      %212 = arith.cmpi slt, %210, %211 : vector<1x256xi32>
      %213 = arith.andi %208, %212 : vector<1x256xi1>
      %cst_70 = arith.constant 0.000000e+00 : f32
      %214 = vector.broadcast %cst_70 : f32 to vector<4x256xf32>
      %215 = vector.shape_cast %213 : vector<1x256xi1> to vector<1x256xi1>
      %216 = vector.broadcast %215 : vector<1x256xi1> to vector<4x256xi1>
      %217 = arith.select %216, %204, %214 : vector<4x256xi1>, vector<4x256xf32>
      %218 = vector.extract_strided_slice %14 {offsets = [0, 53], sizes = [4, 256], strides = [1, 1]} : vector<4x358xf32> to vector<4x256xf32>
      %c2_i32_71 = arith.constant 2 : i32
      %219 = vector.broadcast %c2_i32_71 : i32 to vector<1x256xi32>
      %220 = arith.addi %17, %219 : vector<1x256xi32>
      %c0_i32_72 = arith.constant 0 : i32
      %221 = vector.broadcast %c0_i32_72 : i32 to vector<1x256xi32>
      %222 = arith.cmpi sge, %220, %221 : vector<1x256xi32>
      %c2_i32_73 = arith.constant 2 : i32
      %223 = vector.broadcast %c2_i32_73 : i32 to vector<1x256xi32>
      %224 = arith.addi %17, %223 : vector<1x256xi32>
      %c16_i32_74 = arith.constant 16 : i32
      %225 = vector.broadcast %c16_i32_74 : i32 to vector<1x256xi32>
      %226 = arith.cmpi slt, %224, %225 : vector<1x256xi32>
      %227 = arith.andi %222, %226 : vector<1x256xi1>
      %cst_75 = arith.constant 0.000000e+00 : f32
      %228 = vector.broadcast %cst_75 : f32 to vector<4x256xf32>
      %229 = vector.shape_cast %227 : vector<1x256xi1> to vector<1x256xi1>
      %230 = vector.broadcast %229 : vector<1x256xi1> to vector<4x256xi1>
      %231 = arith.select %230, %218, %228 : vector<4x256xi1>, vector<4x256xf32>
      %232 = vector.extract_strided_slice %14 {offsets = [0, 54], sizes = [4, 256], strides = [1, 1]} : vector<4x358xf32> to vector<4x256xf32>
      %c3_i32_76 = arith.constant 3 : i32
      %233 = vector.broadcast %c3_i32_76 : i32 to vector<1x256xi32>
      %234 = arith.addi %17, %233 : vector<1x256xi32>
      %c0_i32_77 = arith.constant 0 : i32
      %235 = vector.broadcast %c0_i32_77 : i32 to vector<1x256xi32>
      %236 = arith.cmpi sge, %234, %235 : vector<1x256xi32>
      %c3_i32_78 = arith.constant 3 : i32
      %237 = vector.broadcast %c3_i32_78 : i32 to vector<1x256xi32>
      %238 = arith.addi %17, %237 : vector<1x256xi32>
      %c16_i32_79 = arith.constant 16 : i32
      %239 = vector.broadcast %c16_i32_79 : i32 to vector<1x256xi32>
      %240 = arith.cmpi slt, %238, %239 : vector<1x256xi32>
      %241 = arith.andi %236, %240 : vector<1x256xi1>
      %cst_80 = arith.constant 0.000000e+00 : f32
      %242 = vector.broadcast %cst_80 : f32 to vector<4x256xf32>
      %243 = vector.shape_cast %241 : vector<1x256xi1> to vector<1x256xi1>
      %244 = vector.broadcast %243 : vector<1x256xi1> to vector<4x256xi1>
      %245 = arith.select %244, %232, %242 : vector<4x256xi1>, vector<4x256xf32>
      %246 = vector.extract_strided_slice %14 {offsets = [0, 65], sizes = [4, 256], strides = [1, 1]} : vector<4x358xf32> to vector<4x256xf32>
      %c-2_i32_81 = arith.constant -2 : i32
      %247 = vector.broadcast %c-2_i32_81 : i32 to vector<1x256xi32>
      %248 = arith.addi %17, %247 : vector<1x256xi32>
      %c0_i32_82 = arith.constant 0 : i32
      %249 = vector.broadcast %c0_i32_82 : i32 to vector<1x256xi32>
      %250 = arith.cmpi sge, %248, %249 : vector<1x256xi32>
      %c-2_i32_83 = arith.constant -2 : i32
      %251 = vector.broadcast %c-2_i32_83 : i32 to vector<1x256xi32>
      %252 = arith.addi %17, %251 : vector<1x256xi32>
      %c16_i32_84 = arith.constant 16 : i32
      %253 = vector.broadcast %c16_i32_84 : i32 to vector<1x256xi32>
      %254 = arith.cmpi slt, %252, %253 : vector<1x256xi32>
      %255 = arith.andi %250, %254 : vector<1x256xi1>
      %cst_85 = arith.constant 0.000000e+00 : f32
      %256 = vector.broadcast %cst_85 : f32 to vector<4x256xf32>
      %257 = vector.shape_cast %255 : vector<1x256xi1> to vector<1x256xi1>
      %258 = vector.broadcast %257 : vector<1x256xi1> to vector<4x256xi1>
      %259 = arith.select %258, %246, %256 : vector<4x256xi1>, vector<4x256xf32>
      %260 = vector.extract_strided_slice %14 {offsets = [0, 66], sizes = [4, 256], strides = [1, 1]} : vector<4x358xf32> to vector<4x256xf32>
      %c-1_i32_86 = arith.constant -1 : i32
      %261 = vector.broadcast %c-1_i32_86 : i32 to vector<1x256xi32>
      %262 = arith.addi %17, %261 : vector<1x256xi32>
      %c0_i32_87 = arith.constant 0 : i32
      %263 = vector.broadcast %c0_i32_87 : i32 to vector<1x256xi32>
      %264 = arith.cmpi sge, %262, %263 : vector<1x256xi32>
      %c-1_i32_88 = arith.constant -1 : i32
      %265 = vector.broadcast %c-1_i32_88 : i32 to vector<1x256xi32>
      %266 = arith.addi %17, %265 : vector<1x256xi32>
      %c16_i32_89 = arith.constant 16 : i32
      %267 = vector.broadcast %c16_i32_89 : i32 to vector<1x256xi32>
      %268 = arith.cmpi slt, %266, %267 : vector<1x256xi32>
      %269 = arith.andi %264, %268 : vector<1x256xi1>
      %cst_90 = arith.constant 0.000000e+00 : f32
      %270 = vector.broadcast %cst_90 : f32 to vector<4x256xf32>
      %271 = vector.shape_cast %269 : vector<1x256xi1> to vector<1x256xi1>
      %272 = vector.broadcast %271 : vector<1x256xi1> to vector<4x256xi1>
      %273 = arith.select %272, %260, %270 : vector<4x256xi1>, vector<4x256xf32>
      %274 = vector.extract_strided_slice %14 {offsets = [0, 67], sizes = [4, 256], strides = [1, 1]} : vector<4x358xf32> to vector<4x256xf32>
      %275 = vector.extract_strided_slice %14 {offsets = [0, 68], sizes = [4, 256], strides = [1, 1]} : vector<4x358xf32> to vector<4x256xf32>
      %c1_i32_91 = arith.constant 1 : i32
      %276 = vector.broadcast %c1_i32_91 : i32 to vector<1x256xi32>
      %277 = arith.addi %17, %276 : vector<1x256xi32>
      %c0_i32_92 = arith.constant 0 : i32
      %278 = vector.broadcast %c0_i32_92 : i32 to vector<1x256xi32>
      %279 = arith.cmpi sge, %277, %278 : vector<1x256xi32>
      %c1_i32_93 = arith.constant 1 : i32
      %280 = vector.broadcast %c1_i32_93 : i32 to vector<1x256xi32>
      %281 = arith.addi %17, %280 : vector<1x256xi32>
      %c16_i32_94 = arith.constant 16 : i32
      %282 = vector.broadcast %c16_i32_94 : i32 to vector<1x256xi32>
      %283 = arith.cmpi slt, %281, %282 : vector<1x256xi32>
      %284 = arith.andi %279, %283 : vector<1x256xi1>
      %cst_95 = arith.constant 0.000000e+00 : f32
      %285 = vector.broadcast %cst_95 : f32 to vector<4x256xf32>
      %286 = vector.shape_cast %284 : vector<1x256xi1> to vector<1x256xi1>
      %287 = vector.broadcast %286 : vector<1x256xi1> to vector<4x256xi1>
      %288 = arith.select %287, %275, %285 : vector<4x256xi1>, vector<4x256xf32>
      %289 = vector.extract_strided_slice %14 {offsets = [0, 69], sizes = [4, 256], strides = [1, 1]} : vector<4x358xf32> to vector<4x256xf32>
      %c2_i32_96 = arith.constant 2 : i32
      %290 = vector.broadcast %c2_i32_96 : i32 to vector<1x256xi32>
      %291 = arith.addi %17, %290 : vector<1x256xi32>
      %c0_i32_97 = arith.constant 0 : i32
      %292 = vector.broadcast %c0_i32_97 : i32 to vector<1x256xi32>
      %293 = arith.cmpi sge, %291, %292 : vector<1x256xi32>
      %c2_i32_98 = arith.constant 2 : i32
      %294 = vector.broadcast %c2_i32_98 : i32 to vector<1x256xi32>
      %295 = arith.addi %17, %294 : vector<1x256xi32>
      %c16_i32_99 = arith.constant 16 : i32
      %296 = vector.broadcast %c16_i32_99 : i32 to vector<1x256xi32>
      %297 = arith.cmpi slt, %295, %296 : vector<1x256xi32>
      %298 = arith.andi %293, %297 : vector<1x256xi1>
      %cst_100 = arith.constant 0.000000e+00 : f32
      %299 = vector.broadcast %cst_100 : f32 to vector<4x256xf32>
      %300 = vector.shape_cast %298 : vector<1x256xi1> to vector<1x256xi1>
      %301 = vector.broadcast %300 : vector<1x256xi1> to vector<4x256xi1>
      %302 = arith.select %301, %289, %299 : vector<4x256xi1>, vector<4x256xf32>
      %303 = vector.extract_strided_slice %14 {offsets = [0, 81], sizes = [4, 256], strides = [1, 1]} : vector<4x358xf32> to vector<4x256xf32>
      %c-2_i32_101 = arith.constant -2 : i32
      %304 = vector.broadcast %c-2_i32_101 : i32 to vector<1x256xi32>
      %305 = arith.addi %17, %304 : vector<1x256xi32>
      %c0_i32_102 = arith.constant 0 : i32
      %306 = vector.broadcast %c0_i32_102 : i32 to vector<1x256xi32>
      %307 = arith.cmpi sge, %305, %306 : vector<1x256xi32>
      %c-2_i32_103 = arith.constant -2 : i32
      %308 = vector.broadcast %c-2_i32_103 : i32 to vector<1x256xi32>
      %309 = arith.addi %17, %308 : vector<1x256xi32>
      %c16_i32_104 = arith.constant 16 : i32
      %310 = vector.broadcast %c16_i32_104 : i32 to vector<1x256xi32>
      %311 = arith.cmpi slt, %309, %310 : vector<1x256xi32>
      %312 = arith.andi %307, %311 : vector<1x256xi1>
      %cst_105 = arith.constant 0.000000e+00 : f32
      %313 = vector.broadcast %cst_105 : f32 to vector<4x256xf32>
      %314 = vector.shape_cast %312 : vector<1x256xi1> to vector<1x256xi1>
      %315 = vector.broadcast %314 : vector<1x256xi1> to vector<4x256xi1>
      %316 = arith.select %315, %303, %313 : vector<4x256xi1>, vector<4x256xf32>
      %317 = vector.extract_strided_slice %14 {offsets = [0, 82], sizes = [4, 256], strides = [1, 1]} : vector<4x358xf32> to vector<4x256xf32>
      %c-1_i32_106 = arith.constant -1 : i32
      %318 = vector.broadcast %c-1_i32_106 : i32 to vector<1x256xi32>
      %319 = arith.addi %17, %318 : vector<1x256xi32>
      %c0_i32_107 = arith.constant 0 : i32
      %320 = vector.broadcast %c0_i32_107 : i32 to vector<1x256xi32>
      %321 = arith.cmpi sge, %319, %320 : vector<1x256xi32>
      %c-1_i32_108 = arith.constant -1 : i32
      %322 = vector.broadcast %c-1_i32_108 : i32 to vector<1x256xi32>
      %323 = arith.addi %17, %322 : vector<1x256xi32>
      %c16_i32_109 = arith.constant 16 : i32
      %324 = vector.broadcast %c16_i32_109 : i32 to vector<1x256xi32>
      %325 = arith.cmpi slt, %323, %324 : vector<1x256xi32>
      %326 = arith.andi %321, %325 : vector<1x256xi1>
      %cst_110 = arith.constant 0.000000e+00 : f32
      %327 = vector.broadcast %cst_110 : f32 to vector<4x256xf32>
      %328 = vector.shape_cast %326 : vector<1x256xi1> to vector<1x256xi1>
      %329 = vector.broadcast %328 : vector<1x256xi1> to vector<4x256xi1>
      %330 = arith.select %329, %317, %327 : vector<4x256xi1>, vector<4x256xf32>
      %331 = vector.extract_strided_slice %14 {offsets = [0, 83], sizes = [4, 256], strides = [1, 1]} : vector<4x358xf32> to vector<4x256xf32>
      %332 = vector.extract_strided_slice %14 {offsets = [0, 84], sizes = [4, 256], strides = [1, 1]} : vector<4x358xf32> to vector<4x256xf32>
      %c1_i32_111 = arith.constant 1 : i32
      %333 = vector.broadcast %c1_i32_111 : i32 to vector<1x256xi32>
      %334 = arith.addi %17, %333 : vector<1x256xi32>
      %c0_i32_112 = arith.constant 0 : i32
      %335 = vector.broadcast %c0_i32_112 : i32 to vector<1x256xi32>
      %336 = arith.cmpi sge, %334, %335 : vector<1x256xi32>
      %c1_i32_113 = arith.constant 1 : i32
      %337 = vector.broadcast %c1_i32_113 : i32 to vector<1x256xi32>
      %338 = arith.addi %17, %337 : vector<1x256xi32>
      %c16_i32_114 = arith.constant 16 : i32
      %339 = vector.broadcast %c16_i32_114 : i32 to vector<1x256xi32>
      %340 = arith.cmpi slt, %338, %339 : vector<1x256xi32>
      %341 = arith.andi %336, %340 : vector<1x256xi1>
      %cst_115 = arith.constant 0.000000e+00 : f32
      %342 = vector.broadcast %cst_115 : f32 to vector<4x256xf32>
      %343 = vector.shape_cast %341 : vector<1x256xi1> to vector<1x256xi1>
      %344 = vector.broadcast %343 : vector<1x256xi1> to vector<4x256xi1>
      %345 = arith.select %344, %332, %342 : vector<4x256xi1>, vector<4x256xf32>
      %346 = vector.extract_strided_slice %14 {offsets = [0, 85], sizes = [4, 256], strides = [1, 1]} : vector<4x358xf32> to vector<4x256xf32>
      %c2_i32_116 = arith.constant 2 : i32
      %347 = vector.broadcast %c2_i32_116 : i32 to vector<1x256xi32>
      %348 = arith.addi %17, %347 : vector<1x256xi32>
      %c0_i32_117 = arith.constant 0 : i32
      %349 = vector.broadcast %c0_i32_117 : i32 to vector<1x256xi32>
      %350 = arith.cmpi sge, %348, %349 : vector<1x256xi32>
      %c2_i32_118 = arith.constant 2 : i32
      %351 = vector.broadcast %c2_i32_118 : i32 to vector<1x256xi32>
      %352 = arith.addi %17, %351 : vector<1x256xi32>
      %c16_i32_119 = arith.constant 16 : i32
      %353 = vector.broadcast %c16_i32_119 : i32 to vector<1x256xi32>
      %354 = arith.cmpi slt, %352, %353 : vector<1x256xi32>
      %355 = arith.andi %350, %354 : vector<1x256xi1>
      %cst_120 = arith.constant 0.000000e+00 : f32
      %356 = vector.broadcast %cst_120 : f32 to vector<4x256xf32>
      %357 = vector.shape_cast %355 : vector<1x256xi1> to vector<1x256xi1>
      %358 = vector.broadcast %357 : vector<1x256xi1> to vector<4x256xi1>
      %359 = arith.select %358, %346, %356 : vector<4x256xi1>, vector<4x256xf32>
      %360 = vector.extract_strided_slice %14 {offsets = [0, 96], sizes = [4, 256], strides = [1, 1]} : vector<4x358xf32> to vector<4x256xf32>
      %c-3_i32_121 = arith.constant -3 : i32
      %361 = vector.broadcast %c-3_i32_121 : i32 to vector<1x256xi32>
      %362 = arith.addi %17, %361 : vector<1x256xi32>
      %c0_i32_122 = arith.constant 0 : i32
      %363 = vector.broadcast %c0_i32_122 : i32 to vector<1x256xi32>
      %364 = arith.cmpi sge, %362, %363 : vector<1x256xi32>
      %c-3_i32_123 = arith.constant -3 : i32
      %365 = vector.broadcast %c-3_i32_123 : i32 to vector<1x256xi32>
      %366 = arith.addi %17, %365 : vector<1x256xi32>
      %c16_i32_124 = arith.constant 16 : i32
      %367 = vector.broadcast %c16_i32_124 : i32 to vector<1x256xi32>
      %368 = arith.cmpi slt, %366, %367 : vector<1x256xi32>
      %369 = arith.andi %364, %368 : vector<1x256xi1>
      %cst_125 = arith.constant 0.000000e+00 : f32
      %370 = vector.broadcast %cst_125 : f32 to vector<4x256xf32>
      %371 = vector.shape_cast %369 : vector<1x256xi1> to vector<1x256xi1>
      %372 = vector.broadcast %371 : vector<1x256xi1> to vector<4x256xi1>
      %373 = arith.select %372, %360, %370 : vector<4x256xi1>, vector<4x256xf32>
      %374 = vector.extract_strided_slice %14 {offsets = [0, 99], sizes = [4, 256], strides = [1, 1]} : vector<4x358xf32> to vector<4x256xf32>
      %375 = vector.extract_strided_slice %14 {offsets = [0, 102], sizes = [4, 256], strides = [1, 1]} : vector<4x358xf32> to vector<4x256xf32>
      %c3_i32_126 = arith.constant 3 : i32
      %376 = vector.broadcast %c3_i32_126 : i32 to vector<1x256xi32>
      %377 = arith.addi %17, %376 : vector<1x256xi32>
      %c0_i32_127 = arith.constant 0 : i32
      %378 = vector.broadcast %c0_i32_127 : i32 to vector<1x256xi32>
      %379 = arith.cmpi sge, %377, %378 : vector<1x256xi32>
      %c3_i32_128 = arith.constant 3 : i32
      %380 = vector.broadcast %c3_i32_128 : i32 to vector<1x256xi32>
      %381 = arith.addi %17, %380 : vector<1x256xi32>
      %c16_i32_129 = arith.constant 16 : i32
      %382 = vector.broadcast %c16_i32_129 : i32 to vector<1x256xi32>
      %383 = arith.cmpi slt, %381, %382 : vector<1x256xi32>
      %384 = arith.andi %379, %383 : vector<1x256xi1>
      %cst_130 = arith.constant 0.000000e+00 : f32
      %385 = vector.broadcast %cst_130 : f32 to vector<4x256xf32>
      %386 = vector.shape_cast %384 : vector<1x256xi1> to vector<1x256xi1>
      %387 = vector.broadcast %386 : vector<1x256xi1> to vector<4x256xi1>
      %388 = arith.select %387, %375, %385 : vector<4x256xi1>, vector<4x256xf32>
      %389 = tpu.concatenate %31, %32, %46, %60, %74, %75, %89, %103, %117, %131, %132, %146, %160, %174, %188, %202 in 0 : vector<4x256xf32>, vector<4x256xf32>, vector<4x256xf32>, vector<4x256xf32>, vector<4x256xf32>, vector<4x256xf32>, vector<4x256xf32>, vector<4x256xf32>, vector<4x256xf32>, vector<4x256xf32>, vector<4x256xf32>, vector<4x256xf32>, vector<4x256xf32>, vector<4x256xf32>, vector<4x256xf32>, vector<4x256xf32> -> vector<64x256xf32>
      %390 = tpu.concatenate %203, %217, %231, %245, %259, %273, %274, %288, %302, %316, %330, %331, %345, %359, %373, %374 in 0 : vector<4x256xf32>, vector<4x256xf32>, vector<4x256xf32>, vector<4x256xf32>, vector<4x256xf32>, vector<4x256xf32>, vector<4x256xf32>, vector<4x256xf32>, vector<4x256xf32>, vector<4x256xf32>, vector<4x256xf32>, vector<4x256xf32>, vector<4x256xf32>, vector<4x256xf32>, vector<4x256xf32>, vector<4x256xf32> -> vector<64x256xf32>
      %391 = tpu.concatenate %389, %390, %388 in 0 : vector<64x256xf32>, vector<64x256xf32>, vector<4x256xf32> -> vector<132x256xf32>
      %392 = arith.truncf %391 : vector<132x256xf32> to vector<132x256xbf16>
      %c0_131 = arith.constant 0 : index
      %c0_132 = arith.constant 0 : index
      %393 = vector.load %arg3[%c0_131, %c0_132] : memref<16x132xbf16, #tpu.memory_space<vmem>>, vector<16x132xbf16>
      %cst_133 = arith.constant dense<0.000000e+00> : vector<16x256xf32>
      %394 = tpu.matmul %393, %392, %cst_133 {dimension_numbers = #tpu.dot_dimension_numbers<[1], [0], [0], [1], [0, 0, 1, 1], [], []>} : vector<16x132xbf16>, vector<132x256xbf16>, vector<16x256xf32> -> vector<16x256xf32>
      %c0_134 = arith.constant 0 : index
      %c0_135 = arith.constant 0 : index
      %395 = vector.load %arg7[%c0_134, %c0_135] : memref<16x1xf32, #tpu.memory_space<vmem>>, vector<16x1xf32>
      %cst_136 = arith.constant dense<0.000000e+00> : vector<16xf32>
      %396 = vector.multi_reduction <add>, %394, %cst_136 [1] : vector<16x256xf32> to vector<16xf32>
      %397 = vector.shape_cast %396 : vector<16xf32> to vector<16x1xf32>
      %398 = arith.addf %395, %397 : vector<16x1xf32>
      %c0_137 = arith.constant 0 : index
      %c0_138 = arith.constant 0 : index
      %399 = vector.load %arg7[%c0_137, %c0_138] : memref<16x1xf32, #tpu.memory_space<vmem>>, vector<16x1xf32>
      tpu.vector_store %arg7[%c0_137, %c0_138], %398 {strides = array<i32>} : memref<16x1xf32, #tpu.memory_space<vmem>>, vector<16x1xf32>,
      %c0_139 = arith.constant 0 : index
      %c0_140 = arith.constant 0 : index
      %400 = vector.load %arg8[%c0_139, %c0_140] : memref<16x1xf32, #tpu.memory_space<vmem>>, vector<16x1xf32>
      %401 = arith.mulf %394, %394 : vector<16x256xf32>
      %cst_141 = arith.constant dense<0.000000e+00> : vector<16xf32>
      %402 = vector.multi_reduction <add>, %401, %cst_141 [1] : vector<16x256xf32> to vector<16xf32>
      %403 = vector.shape_cast %402 : vector<16xf32> to vector<16x1xf32>
      %404 = arith.addf %400, %403 : vector<16x1xf32>
      %c0_142 = arith.constant 0 : index
      %c0_143 = arith.constant 0 : index
      %405 = vector.load %arg8[%c0_142, %c0_143] : memref<16x1xf32, #tpu.memory_space<vmem>>, vector<16x1xf32>
      tpu.vector_store %arg8[%c0_142, %c0_143], %404 {strides = array<i32>} : memref<16x1xf32, #tpu.memory_space<vmem>>, vector<16x1xf32>,
      %406 = arith.index_cast %arg1 : i32 to index
      %c0_144 = arith.constant 0 : index
      %c0_145 = arith.constant 0 : index
      %407 = vector.load %arg9[%406, %c0_144, %c0_145] : memref<2x16x256xf32, #tpu.memory_space<vmem>>, vector<1x16x256xf32>
      %408 = vector.shape_cast %407 : vector<1x16x256xf32> to vector<16x256xf32>
      %409 = vector.shape_cast %394 : vector<16x256xf32> to vector<1x16x256xf32>
      tpu.vector_store %arg9[%406, %c0_144, %c0_145], %409 {strides = array<i32>} : memref<2x16x256xf32, #tpu.memory_space<vmem>>, vector<1x16x256xf32>,
      %c0_146 = arith.constant 0 : index
      %c0_147 = arith.constant 0 : index
      %c0_148 = arith.constant 0 : index
      %410 = vector.load %arg6[%c0_146, %c0_147, %c0_148] : memref<1x16x256xf32, #tpu.memory_space<vmem>>, vector<1x16x256xf32>
      %411 = vector.shape_cast %410 : vector<1x16x256xf32> to vector<16x256xf32>
      %412 = vector.shape_cast %394 : vector<16x256xf32> to vector<1x16x256xf32>
      tpu.vector_store %arg6[%c0_146, %c0_147, %c0_148], %412 {strides = array<i32>} : memref<1x16x256xf32, #tpu.memory_space<vmem>>, vector<1x16x256xf32>,
    } else {
    }
    %c1_i32 = arith.constant 1 : i32
    %8 = arith.cmpi eq, %arg0, %c1_i32 : i32
    %9 = arith.extui %8 : i1 to i32
    %c0_i32_4 = arith.constant 0 : i32
    %10 = arith.cmpi ne, %9, %c0_i32_4 : i32
    scf.if %10 {
      %c0 = arith.constant 0 : index
      %c0_5 = arith.constant 0 : index
      %11 = vector.load %arg7[%c0, %c0_5] : memref<16x1xf32, #tpu.memory_space<vmem>>, vector<16x1xf32>
      %cst = arith.constant 0.001953125 : f32
      %12 = vector.broadcast %cst : f32 to vector<16x1xf32>
      %13 = arith.mulf %11, %12 : vector<16x1xf32>
      %c0_6 = arith.constant 0 : index
      %c0_7 = arith.constant 0 : index
      %14 = vector.load %arg8[%c0_6, %c0_7] : memref<16x1xf32, #tpu.memory_space<vmem>>, vector<16x1xf32>
      %cst_8 = arith.constant 0.001953125 : f32
      %15 = vector.broadcast %cst_8 : f32 to vector<16x1xf32>
      %16 = arith.mulf %14, %15 : vector<16x1xf32>
      %17 = arith.mulf %13, %13 : vector<16x1xf32>
      %18 = arith.subf %16, %17 : vector<16x1xf32>
      %c0_9 = arith.constant 0 : index
      %c0_10 = arith.constant 0 : index
      %19 = vector.load %arg4[%c0_9, %c0_10] : memref<16x1xf32, #tpu.memory_space<vmem>>, vector<16x1xf32>
      %cst_11 = arith.constant 9.99999974E-6 : f32
      %20 = vector.broadcast %cst_11 : f32 to vector<16x1xf32>
      %21 = arith.addf %18, %20 : vector<16x1xf32>
      %22 = math.rsqrt %21 : vector<16x1xf32>
      %23 = arith.mulf %19, %22 : vector<16x1xf32>
      %c0_12 = arith.constant 0 : index
      %c0_13 = arith.constant 0 : index
      %24 = vector.load %arg5[%c0_12, %c0_13] : memref<16x1xf32, #tpu.memory_space<vmem>>, vector<16x1xf32>
      %25 = arith.mulf %13, %23 : vector<16x1xf32>
      %26 = arith.subf %24, %25 : vector<16x1xf32>
      %27 = arith.index_cast %arg1 : i32 to index
      %c0_14 = arith.constant 0 : index
      %c0_15 = arith.constant 0 : index
      %28 = vector.load %arg9[%27, %c0_14, %c0_15] : memref<2x16x256xf32, #tpu.memory_space<vmem>>, vector<1x16x256xf32>
      %29 = vector.shape_cast %28 : vector<1x16x256xf32> to vector<16x256xf32>
      %30 = vector.broadcast %23 : vector<16x1xf32> to vector<16x256xf32>
      %31 = arith.mulf %29, %30 : vector<16x256xf32>
      %32 = vector.broadcast %26 : vector<16x1xf32> to vector<16x256xf32>
      %33 = arith.addf %31, %32 : vector<16x256xf32>
      %cst_16 = arith.constant 0.000000e+00 : f32
      %34 = vector.broadcast %cst_16 : f32 to vector<16x256xf32>
      %35 = arith.cmpf oge, %33, %34 : vector<16x256xf32>
      %cst_17 = arith.constant 0.00999999977 : f32
      %36 = vector.broadcast %cst_17 : f32 to vector<16x256xf32>
      %37 = arith.mulf %36, %33 : vector<16x256xf32>
      %38 = arith.select %35, %33, %37 : vector<16x256xi1>, vector<16x256xf32>
      %c0_18 = arith.constant 0 : index
      %c0_19 = arith.constant 0 : index
      %c0_20 = arith.constant 0 : index
      %39 = vector.load %arg6[%c0_18, %c0_19, %c0_20] : memref<1x16x256xf32, #tpu.memory_space<vmem>>, vector<1x16x256xf32>
      %40 = vector.shape_cast %39 : vector<1x16x256xf32> to vector<16x256xf32>
      %41 = vector.shape_cast %38 : vector<16x256xf32> to vector<1x16x256xf32>
      tpu.vector_store %arg6[%c0_18, %c0_19, %c0_20], %41 {strides = array<i32>} : memref<1x16x256xf32, #tpu.memory_space<vmem>>, vector<1x16x256xf32>,
    } else {
    }
    return
  }
  func.func @transform_0(%arg0: i32, %arg1: i32) -> (i32, i32, i32) {
    %c1_i32 = arith.constant 1 : i32
    %0 = arith.subi %c1_i32, %arg0 : i32
    %1 = arith.muli %arg1, %0 : i32
    %c1_i32_0 = arith.constant 1 : i32
    %2 = arith.muli %c1_i32_0, %arg0 : i32
    %3 = arith.addi %1, %2 : i32
    %c0_i32 = arith.constant 0 : i32
    %c0_i32_1 = arith.constant 0 : i32
    %c0_i32_2 = arith.constant 0 : i32
    return %3, %c0_i32, %c0_i32_1 : i32, i32, i32
  }
  func.func @transform_1(%arg0: i32, %arg1: i32) -> (i32, i32) {
    %c0_i32 = arith.constant 0 : i32
    %c0_i32_0 = arith.constant 0 : i32
    %c0_i32_1 = arith.constant 0 : i32
    return %c0_i32, %c0_i32_0 : i32, i32
  }
  func.func @transform_2(%arg0: i32, %arg1: i32) -> (i32, i32) {
    %c0_i32 = arith.constant 0 : i32
    %c0_i32_0 = arith.constant 0 : i32
    %c0_i32_1 = arith.constant 0 : i32
    return %c0_i32, %c0_i32_0 : i32, i32
  }
  func.func @transform_3(%arg0: i32, %arg1: i32) -> (i32, i32) {
    %c0_i32 = arith.constant 0 : i32
    %c0_i32_0 = arith.constant 0 : i32
    %c0_i32_1 = arith.constant 0 : i32
    return %c0_i32, %c0_i32_0 : i32, i32
  }
  func.func @transform_4(%arg0: i32, %arg1: i32) -> (i32, i32, i32) {
    %c0_i32 = arith.constant 0 : i32
    %c0_i32_0 = arith.constant 0 : i32
    %c0_i32_1 = arith.constant 0 : i32
    return %arg1, %c0_i32, %c0_i32_0 : i32, i32, i32
  }
}

</mosaic_0001>

<bundles_post_ra>
// kernel: skconv_block1plus.1
= control target key start
LH: loop header
LB: loop body
LE: loop exit
PB: predicated region body
PF: predicated region fallthrough
CT: control target
= control target key end

     0   :  { %s1818_s15 = smov 0   ;;  %s1820_s16 = smov 0   ;;  %s2404_s0 = inlined_call_operand.vmem [shape: f32[2,4,256], index: 0, kind: input, shape index: {}]   ;;  %s2405_s1 = inlined_call_operand.vmem [shape: bf16[16,132], index: 1, kind: input, shape index: {}]   ;;  %s2406_s2 = inlined_call_operand.vmem [shape: f32[16,1], index: 2, kind: input, shape index: {}]   ;;  %s2407_s3 = inlined_call_operand.vmem [shape: f32[16,1], index: 3, kind: input, shape index: {}]   ;;  %s2408_s4 = inlined_call_operand.vmem [shape: f32[2,16,256], index: 4, kind: output, shape index: {}]  }
   0x1   :  { %s1822_s17 = smov 0   ;;  %s1824_s18 = smov 0  }
   0x2   :  { %s1826_s19 = smov 0  }
   0x3 LB: > { %s23_s20 = sadd.s32 1, %s1749_s17  ;;  %s26_s21 = sadd.s32 1, %s1753_s18  ;;  %s1757_s19 = sphi %s1826_s19, %s14_s19   ;;  %s1753_s18 = sphi %s1824_s18, %s2434_s18   ;;  %s1749_s17 = sphi %s1822_s17, %s2433_s17   ;;  %s1745_s16 = sphi %s1820_s16, %s2432_s16   ;;  %s1741_s15 = sphi %s1818_s15, %s2431_s15  }
   0x4   : > { %p24_p0 = scmp.ge.s32.totalorder %s23_s20, 2  ;;  %p1329_p1 = scmp.ge.s32.totalorder %s1757_s19, 1 }
   0x5   : > { %p186_p2 = scmp.lt.s32.totalorder %s1757_s19, 5 }
   0x6   : > { %s2436_s20 = smov (%p24_p0, %s23_s20), 0  ;;  %s2438_s21 = smov (!%p24_p0, %s26_s21), %s1753_s18 }
   0x7   : > { %p187_p3 = pnand %p1329_p1, %p186_p2  ;;  %p28_p4 = scmp.ge.s32.totalorder %s2438_s21, 2 }
   0x8   : > { %s215_s22 = ssub.s32 (!%p187_p3), 1, %s1745_s16  ;;  %p226_p5 = scmp.lt.s32.totalorder (!%p187_p3), %s1741_s15, 1 }
   0x9   : > { %s2440_s21 = smov (%p28_p4, %s2438_s21), 0  ;;  %190 = sbr.rel (%p187_p3) target bundleno = 1115 (0x45b), region = 36 }
   0xa   : > { %s216_s23 = smul.u32 (!%p187_p3), %s1741_s15, %s215_s22  ;;  %p232_p6 = scmp.eq.s32.totalorder (!%p187_p3), %s1745_s16, 0 }
   0xb   : > { %p233_p7 = scmp.eq.s32.totalorder (!%p187_p3), %s1741_s15, 0 }
   0xc   : > { %s217_s25 = sadd.s32 (!%p187_p3), %s1745_s16, %s216_s23 }
   0xd   : > { %p218_p8 = scmp.lt.s32.totalorder (!%p187_p3), %s217_s25, 1  ;;  %p234_p9 = pnand (!%p187_p3), %p233_p7, %p232_p6 }
  0x10   : > { %s227_s24 = scalar_select %p226_p5, %s1741_s15, 1 }
  0x11   : > { %s2442_s25 = smov (!%p218_p8, %s217_s25), 1  ;;  %237 = sbr.rel (%p234_p9) target bundleno = 24 (0x18), region = 40 }
  0x12   : > { %s1347_s26 = sshll.u32 %s227_s24, 5  ;;  %s1346_s30 = sshll.u32 %s2442_s25, 3  ;;  %vm238_vm0 = vcmask (!%p234_p9), 7168   ;;  %v1759_v0 = vmov (!%p234_p9), 0.0  }
  0x13   : > { %s1862_s29 = scalar_lea.vmem %s2408_s4, %s1347_s26  ;;  %s222_s7 = scalar_lea.vmem %s2404_s0, %s1346_s30  ;;  %239 = vst.msk [vmem:[#allocation2] sm:$0xff] (!%p234_p9), %vm238_vm0, %v1759_v0  ;;  %240 = vst.msk [vmem:[#allocation2 + $0x8] sm:$0xff] (!%p234_p9), %vm238_vm0, %v1759_v0 }
  0x14   : > { %241 = vst.msk [vmem:[#allocation3] sm:$0xff] (!%p234_p9), %vm238_vm0, %v1759_v0  ;;  %242 = vst.msk [vmem:[#allocation3 + $0x8] sm:$0xff] (!%p234_p9), %vm238_vm0, %v1759_v0 }
  0x18 PF: > { %p1334_p10 = scmp.ne.s32.totalorder %s1745_s16, 0 }
  0x19   : > { %v246_v1 = vld [vmem:[%s222_s7] sm:$0xff] (!%p1334_p10)  ;;  %s1760_s8 = smov (!%p1334_p10), 51   ;;  %vm2409_vm1 = vcmask (!%p1334_p10), 416768   ;;  %s1761_s9 = smov (!%p1334_p10), 76   ;;  %v260_v17 = vlaneseq (!%p1334_p10)  ;;  %vm516_vm2 = vcmask (!%p1334_p10), 613376   ;;  %vm542_vm5 = vcmask (!%p1334_p10), 515072  }
  0x1a   : > { %245 = sbr.rel (%p1334_p10) target bundleno = 950 (0x3b6), region = 44  ;;  %v248_v2 = vcombine.high (!%p1334_p10), %v246_v1, %v246_v1  ;;  %s1762_s10 = smov (!%p1334_p10), 74   ;;  %vm503_vm8 = vcmask (!%p1334_p10), 621568   ;;  %vm529_vm10 = vcmask (!%p1334_p10), 605184   ;;  %vm581_vm12 = vcmask (!%p1334_p10), 482304  }
  0x1b   : > { %s1763_s11 = smov (!%p1334_p10), 75   ;;  %s1764_s12 = smov (!%p1334_p10), 62   ;;  %v261_v18 = vand.u32 (!%p1334_p10), 127, %v260_v17  ;;  %vm607_vm0 = vcmask (!%p1334_p10), 375808  }
  0x1c   : > { %v1424_v3 = vpack.i.bf16 (!%p1334_p10), %v248_v2, %v246_v1  ;;  %s1765_s13 = smov (!%p1334_p10), 60   ;;  %s1766_s14 = smov (!%p1334_p10), 63  }
  0x1d   : > { %s1767_s22 = smov (!%p1334_p10), 47   ;;  %s1768_s23 = smov (!%p1334_p10), 59   ;;  %v262_v19 = vadd.s32 (!%p1334_p10), 128, %v261_v18  ;;  %v1940_v22 = vand.u32 (!%p1334_p10), 15, %v261_v18 }
  0x1e   : > { %1425 = vrot.lane.b32.xlu0 (!%p1334_p10), %v1424_v3, %s1760_s8  ;;  %s1769_s24 = smov (!%p1334_p10), 46   ;;  %s1770_s25 = smov (!%p1334_p10), 43  }
  0x1f   : > { %s1771_s26 = smov (!%p1334_p10), 44   ;;  %s1772_s27 = smov (!%p1334_p10), 32   ;;  %v264_v23 = vand.u32 (!%p1334_p10), 15, %v262_v19  ;;  %v1945_v25 = vadd.s32 (!%p1334_p10), 2, %v1940_v22  ;;  %v1965_v40 = vadd.s32 (!%p1334_p10), 4294967294, %v1940_v22  ;;  %v1986_v57 = vadd.s32 (!%p1334_p10), 1, %v1940_v22 }
  0x20   : > { %s1773_s28 = smov (!%p1334_p10), 96   ;;  %s1774_s30 = smov (!%p1334_p10), 112   ;;  %v1993_v60 = vadd.s32 (!%p1334_p10), 3, %v1940_v22  ;;  %v1999_v63 = vadd.s32 (!%p1334_p10), 4294967293, %v1940_v22 }
  0x21   : > { %s1775_s5 = smov 111   ;;  %s1776_s6 = smov 122   ;;  %v1947_v26 = vadd.s32 2, %v264_v23  ;;  %vm2413_vm3 = vcmp.lt.s32.totalorder %v1945_v25, 16  ;;  %v1967_v41 = vadd.s32 4294967294, %v264_v23  ;;  %vm308_vm6 = vcmp.ge.s32.totalorder %v1965_v40, 0 }
  0x22   : > { %s1777_s7 = smov 125   ;;  %v1973_v49 = vadd.s32 3, %v264_v23  ;;  %v1975_v50 = vadd.s32 1, %v264_v23  ;;  %v1988_v58 = vadd.s32 4294967295, %v264_v23  ;;  %v2001_v0 = vadd.s32 4294967293, %v264_v23 }
  0x23   : > { %vm386_vm4 = vcmp.lt.s32.totalorder %v1947_v26, 16  ;;  %vm309_vm7 = vcmp.ge.s32.totalorder %v1967_v41, 0  ;;  %vm360_vm13 = vcmp.lt.s32.totalorder %v1986_v57, 16  ;;  %vm2410_vm15 = vcmp.lt.s32.totalorder %v1993_v60, 16 }
  0x24   : > { %vm2411_vm9 = vcmp.lt.s32.totalorder %v1973_v49, 16  ;;  %vm361_vm11 = vcmp.lt.s32.totalorder %v1975_v50, 16  ;;  %vm334_vm14 = vcmp.ge.s32.totalorder %v1988_v58, 0 }
  0x90   : > { %v1426_v4 = vpop.permute.xlu0 %1425 }
  0x91   : > { %v1428_v5 = vunpack.i.h.bf16 %v1426_v4  ;;  %v1427_v6 = vunpack.i.l.bf16 %v1426_v4 }
  0x93   : > { %v1870_v7 = vsel %vm2409_vm1, %v1428_v5, 0.0  ;;  %v1873_v8 = vsel %vm2409_vm1, %v1427_v6, %v1428_v5  ;;  %v1876_v9 = vsel %vm2409_vm1, 0.0, %v1427_v6  ;;  %vm646_vm1 = vcmask 261120  }
  0x94   : > { %501 = vrot.lane.b32.xlu1 %v1870_v7, %s1761_s9  ;;  %v1881_v10 = vpack.i.bf16 %v1873_v8, %v1876_v9  ;;  %v667_v11 = vrot.slane %v1873_v8, 4  ;;  %v668_v12 = vrot.slane %v1870_v7, 4  ;;  %v1911_v14 = vrot.slane %v1876_v9, 4 }
  0x95   : > { %v1917_v15 = vpack.i.bf16 %v1870_v7, %v1873_v8 }
  0x96   : > { %1430 = vrot.lane.b32.xlu0 %v1881_v10, %s1761_s9  ;;  %v1889_v13 = vpack.i.bf16 %v668_v12, %v667_v11  ;;  %s1778_s9 = smov 107   ;;  %v1494_v16 = vpack.i.bf16 %v1873_v8, %v1911_v14  ;;  %v2011_v11 = vadd.s32 4294967295, %v1940_v22 }
  0x98   : > { %1435 = vrot.lane.b32.xlu1 %v1881_v10, %s1762_s10 }
  0x9a   : > { %527 = vrot.lane.b32.xlu0 %v1870_v7, %s1762_s10  ;;  %s1779_s10 = smov 110  }
  0x9c   : > { %1440 = vrot.lane.b32.xlu1 %v1881_v10, %s1763_s11 }
  0x9e   : > { %514 = vrot.lane.b32.xlu0 %v1870_v7, %s1763_s11  ;;  %s1780_s11 = smov 80  }
  0xa0   : > { %1445 = vrot.lane.b32.xlu1 %v1881_v10, %s1764_s12 }
  0xa2   : > { %553 = vrot.lane.b32.xlu0 %v1870_v7, %s1764_s12  ;;  %s1781_s12 = smov 108  }
  0xa4   : > { %1450 = vrot.lane.b32.xlu1 %v1881_v10, %s1765_s13 }
  0xa6   : > { %566 = vrot.lane.b32.xlu0 %v1870_v7, %s1765_s13  ;;  %s1782_s13 = smov 109  }
  0xa8   : > { %1455 = vrot.lane.b32.xlu1 %v1881_v10, %s1766_s14 }
  0xaa   : > { %540 = vrot.lane.b32.xlu0 %v1870_v7, %s1766_s14  ;;  %s1783_s14 = smov 94  }
  0xac   : > { %1460 = vrot.lane.b32.xlu1 %v1881_v10, %s1767_s22 }
  0xae   : > { %592 = vrot.lane.b32.xlu0 %v1870_v7, %s1767_s22  ;;  %s1785_s22 = smov 95  }
  0xb0   : > { %1465 = vrot.lane.b32.xlu1 %v1881_v10, %s1768_s23 }
  0xb2   : > { %579 = vrot.lane.b32.xlu0 %v1870_v7, %s1768_s23  ;;  %s1786_s23 = smov 93  }
  0xb4   : > { %1470 = vrot.lane.b32.xlu1 %v1881_v10, %s1769_s24 }
  0xb6   : > { %605 = vrot.lane.b32.xlu0 %v1870_v7, %s1769_s24  ;;  %s1787_s24 = smov 78  }
  0xb8   : > { %1475 = vrot.lane.b32.xlu1 %v1881_v10, %s1770_s25 }
  0xba   : > { %631 = vrot.lane.b32.xlu0 %v1870_v7, %s1770_s25  ;;  %s1788_s25 = smov 91  }
  0xbc   : > { %1480 = vrot.lane.b32.xlu1 %v1881_v10, %s1771_s26 }
  0xbe   : > { %618 = vrot.lane.b32.xlu0 %v1870_v7, %s1771_s26  ;;  %s1789_s26 = smov 79  }
  0xc0   : > { %1485 = vrot.lane.b32.xlu1 %v1881_v10, %s1772_s27 }
  0xc2   : > { %644 = vrot.lane.b32.xlu0 %v1870_v7, %s1772_s27  ;;  %s1790_s27 = smov 77  }
  0xc4   : > { %867 = vrot.lane.b32.xlu1 %v1911_v14, %s1773_s28 }
  0xc6   : > { %811 = vrot.lane.b32.xlu0 %v1876_v9, %s1774_s30 }
  0xc8   : > { %1500 = vrot.lane.b32.xlu1 %v1917_v15, %s1775_s5 }
  0xca   : > { %318 = vrot.lane.b32.xlu0 %v1876_v9, %s1775_s5  ;;  %s1791_s5 = smov 26  }
  0xcc   : > { %1505 = vrot.lane.b32.xlu1 %v1917_v15, %s1776_s6 }
  0xce   : > { %293 = vrot.lane.b32.xlu0 %v1876_v9, %s1776_s6 }
  0xd0   : > { %669 = vrot.lane.b32.xlu1 %v1911_v14, %s1777_s7 }
  0xd2   : > { %393 = vrot.lane.b32.xlu0 %v1876_v9, %s1778_s9 }
  0xd4   : > { %1515 = vrot.lane.b32.xlu1 %v1917_v15, %s1779_s10 }
  0xd6   : > { %1490 = vrot.lane.b32.xlu0 %v1917_v15, %s1774_s30 }
  0xd8   : > { %1525 = vrot.lane.b32.xlu1 %v1889_v13, %s1780_s11 }
  0xda   : > { %1495 = vrot.lane.b32.xlu0 %v1494_v16, %s1780_s11 }
  0xdc   : > { %1530 = vrot.lane.b32.xlu1 %v1889_v13, %s1777_s7 }
  0xde   : > { %1510 = vrot.lane.b32.xlu0 %v1917_v15, %s1778_s9  ;;  %s1348_s9 = sshll.u32 %s1741_s15, 5 }
  0xe2   : > { %1520 = vrot.lane.b32.xlu0 %v1889_v13, %s1773_s28 }
 0x106   : > { %v1936_v20 = vpop.permute.xlu1 %501 }
 0x108   : > { %v1938_v21 = vpop.permute.xlu0 %1430 }
 0x109   : > { %v1433_v54 = vunpack.i.h.bf16 %v1938_v21  ;;  %v1432_v55 = vunpack.i.l.bf16 %v1938_v21 }
 0x10a   : > { %v1942_v24 = vpop.permute.xlu1 %1435 }
 0x10b   : > { %v1438_v61 = vunpack.i.h.bf16 %v1942_v24  ;;  %v1437_v62 = vunpack.i.l.bf16 %v1942_v24  ;;  %v504_v2 = vsel %vm503_vm8, %v1432_v55, %v1433_v54  ;;  %v505_v5 = vsel %vm503_vm8, %v1433_v54, %v1936_v20 }
 0x10c   : > { %v1949_v27 = vpop.permute.xlu0 %527  ;;  %v508_v23 = vsel %vm360_vm13, %v504_v2, 0.0  ;;  %vm568_vm8 = vcmask 490496  }
 0x10d   : > { %v530_v12 = vsel %vm529_vm10, %v1437_v62, %v1438_v61  ;;  %v531_v16 = vsel %vm529_vm10, %v1438_v61, %v1949_v27  ;;  %vm2412_vm10 = vcmp.ge.s32.totalorder %v1999_v63, 0 }
 0x10e   : > { %v1441_v28 = vpop.permute.xlu1 %1440  ;;  %v535_v27 = vsel %vm2411_vm9, %v531_v16, 0.0 }
 0x10f   : > { %v1443_v29 = vunpack.i.h.bf16 %v1441_v28  ;;  %v1442_v30 = vunpack.i.l.bf16 %v1441_v28 }
 0x110   : > { %v515_v31 = vpop.permute.xlu0 %514 }
 0x111   : > { %v517_v32 = vsel %vm516_vm2, %v1442_v30, %v1443_v29  ;;  %v518_v33 = vsel %vm516_vm2, %v1443_v29, %v515_v31  ;;  %v509_v29 = vsel %vm361_vm11, %v505_v5, 0.0  ;;  %vm555_vm2 = vcmask 506880  }
 0x112   : > { %v521_v34 = vsel %vm2413_vm3, %v517_v32, 0.0  ;;  %v522_v35 = vsel %vm386_vm4, %v518_v33, 0.0  ;;  %v1957_v36 = vpop.permute.xlu1 %1445  ;;  %v534_v33 = vsel %vm2410_vm15, %v530_v12, 0.0 }
 0x113   : > { %v1534_v37 = vpack.i.bf16 %v522_v35, %v521_v34  ;;  %v1448_v30 = vunpack.i.h.bf16 %v1957_v36  ;;  %v1447_v31 = vunpack.i.l.bf16 %v1957_v36  ;;  %v757_v36 = vrot.slane %v508_v23, 4 }
 0x114   : > { %v1959_v38 = vpop.permute.xlu0 %553 }
 0x115   : > { %1535 = vrot.lane.b32.xlu0 %v1534_v37, %s1760_s8 }
 0x116   : > { %v1962_v39 = vpop.permute.xlu1 %1450 }
 0x117   : > { %v1453_v54 = vunpack.i.h.bf16 %v1962_v39  ;;  %v1452_v55 = vunpack.i.l.bf16 %v1962_v39 }
 0x118   : > { %v1969_v42 = vpop.permute.xlu0 %566 }
 0x119   : > { %v569_v5 = vsel %vm568_vm8, %v1452_v55, %v1453_v54 }
 0x11a   : > { %v1456_v43 = vpop.permute.xlu1 %1455 }
 0x11b   : > { %v1458_v44 = vunpack.i.h.bf16 %v1456_v43  ;;  %v1457_v45 = vunpack.i.l.bf16 %v1456_v43 }
 0x11c   : > { %v541_v46 = vpop.permute.xlu0 %540 }
 0x11d   : > { %v543_v47 = vsel %vm542_vm5, %v1457_v45, %v1458_v44  ;;  %v544_v48 = vsel %vm542_vm5, %v1458_v44, %v541_v46  ;;  %vm333_vm5 = vcmp.ge.s32.totalorder %v2011_v11, 0  ;;  %v758_v45 = vrot.slane %v509_v29, 4 }
 0x11e   : > { %v547_v51 = vsel %vm308_vm6, %v543_v47, 0.0  ;;  %v548_v52 = vsel %vm309_vm7, %v544_v48, 0.0  ;;  %v1981_v53 = vpop.permute.xlu1 %1460  ;;  %v780_v46 = vrot.slane %v535_v27, 4  ;;  %v779_v48 = vrot.slane %v534_v33, 4 }
 0x11f   : > { %v1539_v56 = vpack.i.bf16 %v548_v52, %v547_v51  ;;  %v556_v51 = vsel %vm555_vm2, %v1447_v31, %v1448_v30  ;;  %v557_v52 = vsel %vm555_vm2, %v1448_v30, %v1959_v38  ;;  %v1463_v61 = vunpack.i.h.bf16 %v1981_v53 }
 0x120   : > { %v1990_v59 = vpop.permute.xlu0 %592  ;;  %v1462_v62 = vunpack.i.l.bf16 %v1981_v53  ;;  %v1564_v2 = vpack.i.bf16 %v758_v45, %v757_v36  ;;  %vm2414_vm2 = vcmp.ge.s32.totalorder %v2001_v0, 0  ;;  %v561_v38 = vsel %vm334_vm14, %v557_v52, 0.0 }
 0x121   : > { %1540 = vrot.lane.b32.xlu0 %v1539_v56, %s1760_s8  ;;  %v570_v53 = vsel %vm568_vm8, %v1453_v54, %v1969_v42  ;;  %v1569_v12 = vpack.i.bf16 %v780_v46, %v779_v48  ;;  %vm633_vm8 = vcmask 351232   ;;  %v573_v31 = vsel %vm360_vm13, %v569_v5, 0.0 }
 0x122   : > { %v1466_v1 = vpop.permute.xlu1 %1465  ;;  %v574_v42 = vsel %vm361_vm11, %v570_v53, 0.0 }
 0x123   : > { %v1468_v3 = vunpack.i.h.bf16 %v1466_v1  ;;  %v1467_v4 = vunpack.i.l.bf16 %v1466_v1 }
 0x124   : > { %v580_v6 = vpop.permute.xlu0 %579 }
 0x125   : > { %v582_v17 = vsel %vm581_vm12, %v1467_v4, %v1468_v3  ;;  %v583_v18 = vsel %vm581_vm12, %v1468_v3, %v580_v6  ;;  %vm594_vm12 = vcmask 384000   ;;  %v560_v4 = vsel %vm333_vm5, %v556_v51, 0.0 }
 0x126   : > { %v586_v19 = vsel %vm2413_vm3, %v582_v17, 0.0  ;;  %v587_v21 = vsel %vm386_vm4, %v583_v18, 0.0  ;;  %v1471_v20 = vpop.permute.xlu1 %1470  ;;  %v595_v16 = vsel %vm594_vm12, %v1462_v62, %v1463_v61  ;;  %v596_v17 = vsel %vm594_vm12, %v1463_v61, %v1990_v59 }
 0x127   : > { %v1544_v22 = vpack.i.bf16 %v587_v21, %v586_v19  ;;  %v1473_v24 = vunpack.i.h.bf16 %v1471_v20  ;;  %v1472_v28 = vunpack.i.l.bf16 %v1471_v20  ;;  %v802_v21 = vrot.slane %v561_v38, 4 }
 0x128   : > { %v606_v32 = vpop.permute.xlu0 %605  ;;  %v600_v59 = vsel %vm309_vm7, %v596_v17, 0.0  ;;  %v825_v51 = vrot.slane %v573_v31, 4  ;;  %vm299_vm12 = vcmask 998400  }
 0x129   : > { %v608_v34 = vsel %vm607_vm0, %v1472_v28, %v1473_v24  ;;  %v609_v35 = vsel %vm607_vm0, %v1473_v24, %v606_v32  ;;  %1545 = vrot.lane.b32.xlu1 %v1544_v22, %s1760_s8  ;;  %vm620_vm0 = vcmask 359424   ;;  %v801_v24 = vrot.slane %v560_v4, 4 }
 0x12a   : > { %v612_v37 = vsel %vm333_vm5, %v608_v34, 0.0  ;;  %v613_v43 = vsel %vm334_vm14, %v609_v35, 0.0  ;;  %v2035_v44 = vpop.permute.xlu1 %1475  ;;  %v599_v32 = vsel %vm308_vm6, %v595_v16, 0.0  ;;  %v848_v48 = vrot.slane %v600_v59, 4 }
 0x12b   : > { %v1549_v47 = vpack.i.bf16 %v613_v43, %v612_v37  ;;  %v1478_v33 = vunpack.i.h.bf16 %v2035_v44  ;;  %v1477_v34 = vunpack.i.l.bf16 %v2035_v44  ;;  %v826_v43 = vrot.slane %v574_v42, 4 }
 0x12c   : > { %v632_v56 = vpop.permute.xlu0 %631  ;;  %v847_v52 = vrot.slane %v599_v32, 4 }
 0x12d   : > { %1550 = vrot.lane.b32.xlu1 %v1549_v47, %s1760_s8  ;;  %v1574_v47 = vpack.i.bf16 %v802_v21, %v801_v24  ;;  %v634_v54 = vsel %vm633_vm8, %v1477_v34, %v1478_v33  ;;  %v635_v55 = vsel %vm633_vm8, %v1478_v33, %v632_v56  ;;  %v1579_v62 = vpack.i.bf16 %v826_v43, %v825_v51 }
 0x12e   : > { %v1481_v1 = vpop.permute.xlu1 %1480  ;;  %v638_v38 = vsel %vm2413_vm3, %v634_v54, 0.0  ;;  %vm738_vm8 = vcmask 1043456   ;;  %v1624_v51 = vpack.i.bf16 %v1876_v9, %v1870_v7 }
 0x12f   : > { %v1483_v39 = vunpack.i.h.bf16 %v1481_v1  ;;  %v1482_v3 = vunpack.i.l.bf16 %v1481_v1  ;;  %v1584_v1 = vpack.i.bf16 %v848_v48, %v847_v52  ;;  %v891_v4 = vrot.slane %v638_v38, 4 }
 0x130   : > { %v619_v6 = vpop.permute.xlu0 %618 }
 0x131   : > { %v621_v18 = vsel %vm620_vm0, %v1482_v3, %v1483_v39  ;;  %v622_v19 = vsel %vm620_vm0, %v1483_v39, %v619_v6  ;;  %1565 = vrot.lane.b32.xlu1 %v1564_v2, %s1760_s8  ;;  %v639_v2 = vsel %vm386_vm4, %v635_v55, 0.0  ;;  %vm675_vm0 = vcmask 1022976  }
 0x132   : > { %v625_v20 = vsel %vm360_vm13, %v621_v18, 0.0  ;;  %v626_v23 = vsel %vm361_vm11, %v622_v19, 0.0  ;;  %v1486_v22 = vpop.permute.xlu1 %1485  ;;  %v892_v3 = vrot.slane %v639_v2, 4 }
 0x133   : > { %v1554_v28 = vpack.i.bf16 %v626_v23, %v625_v20  ;;  %v1488_v29 = vunpack.i.h.bf16 %v1486_v22  ;;  %v1487_v27 = vunpack.i.l.bf16 %v1486_v22 }
 0x134   : > { %v645_v30 = vpop.permute.xlu0 %644  ;;  %v1594_v6 = vpack.i.bf16 %v892_v3, %v891_v4 }
 0x135   : > { %v647_v35 = vsel %vm646_vm1, %v1487_v27, %v1488_v29  ;;  %v648_v37 = vsel %vm646_vm1, %v1488_v29, %v645_v30  ;;  %1570 = vrot.lane.b32.xlu1 %v1569_v12, %s1760_s8  ;;  %1555 = vrot.lane.b32.xlu0 %v1554_v28, %s1760_s8  ;;  %vm324_vm1 = vcmask 908288  }
 0x136   : > { %v651_v36 = vsel %vm2412_vm10, %v647_v35, 0.0  ;;  %v652_v45 = vsel %vm2414_vm2, %v648_v37, 0.0  ;;  %v2074_v46 = vpop.permute.xlu1 %867  ;;  %v277_v35 = vsel %vm2412_vm10, %v1876_v9, 0.0 }
 0x137   : > { %v1559_v44 = vpack.i.bf16 %v652_v45, %v651_v36 }
 0x138   : > { %v2084_v39 = vpop.permute.xlu0 %811 }
 0x139   : > { %1575 = vrot.lane.b32.xlu1 %v1574_v47, %s1760_s8  ;;  %1560 = vrot.lane.b32.xlu0 %v1559_v44, %s1760_s8 }
 0x13a   : > { %v1501_v61 = vpop.permute.xlu1 %1500 }
 0x13b   : > { %v1503_v12 = vunpack.i.h.bf16 %v1501_v61  ;;  %v1502_v16 = vunpack.i.l.bf16 %v1501_v61 }
 0x13c   : > { %v319_v53 = vpop.permute.xlu0 %318 }
 0x13d   : > { %1580 = vrot.lane.b32.xlu1 %v1579_v62, %s1760_s8  ;;  %1585 = vrot.lane.b32.xlu0 %v1584_v1, %s1760_s8  ;;  %v326_v20 = vsel %vm324_vm1, %v1502_v16, %v1503_v12  ;;  %v325_v23 = vsel %vm324_vm1, %v319_v53, %v1502_v16  ;;  %vm873_vm1 = vcmask 785408  }
 0x13e   : > { %v1506_v56 = vpop.permute.xlu1 %1505  ;;  %v329_v28 = vsel %vm308_vm6, %v325_v23, 0.0 }
 0x13f   : > { %v1508_v18 = vunpack.i.h.bf16 %v1506_v56  ;;  %v1507_v19 = vunpack.i.l.bf16 %v1506_v56  ;;  %v682_v32 = vrot.slane %v329_v28, 4 }
 0x140   : > { %v294_v21 = vpop.permute.xlu0 %293 }
 0x141   : > { %343 = vrot.lane.b32.xlu1 %v1876_v9, %s1779_s10  ;;  %1590 = vrot.lane.b32.xlu0 %v1917_v15, %s1781_s12  ;;  %v300_v24 = vsel %vm299_vm12, %v294_v21, %v1507_v19  ;;  %v301_v42 = vsel %vm299_vm12, %v1507_v19, %v1508_v18  ;;  %vm2415_vm12 = vcmask 416768   ;;  %s1165_s10 = scalar_lea.vmem [#allocation4], %s1348_s9 }
 0x142   : > { %v670_v5 = vpop.permute.xlu1 %669  ;;  %v304_v27 = vsel %vm2410_vm15, %v300_v24, 0.0  ;;  %v305_v31 = vsel %vm2411_vm9, %v301_v42, 0.0  ;;  %vm399_vm15 = vcmask 875520   ;;  %vm464_vm9 = vcmask 654336  }
 0x143   : > { %v741_v47 = vsel %vm738_vm8, %v304_v27, %v682_v32 }
 0x144   : > { %v394_v52 = vpop.permute.xlu0 %393 }
 0x145   : > { %1595 = vrot.lane.b32.xlu1 %v1594_v6, %s1760_s8  ;;  %368 = vrot.lane.b32.xlu0 %v1876_v9, %s1781_s12  ;;  %s1784_s8 = smov 92  }
 0x146   : > { %v2093_v17 = vpop.permute.xlu1 %1515 }
 0x147   : > { %v1518_v12 = vunpack.i.h.bf16 %v2093_v17  ;;  %v1517_v16 = vunpack.i.l.bf16 %v2093_v17 }
 0x148   : > { %v2134_v54 = vpop.permute.xlu0 %1490 }
 0x149   : > { %1600 = vrot.lane.b32.xlu1 %v1889_v13, %s1782_s13  ;;  %1605 = vrot.lane.b32.xlu0 %v1917_v15, %s1783_s14  ;;  %v330_v13 = vsel %vm309_vm7, %v326_v20, 0.0  ;;  %v1492_v24 = vunpack.i.l.bf16 %v2134_v54 }
 0x14a   : > { %v2097_v22 = vpop.permute.xlu1 %1525  ;;  %v683_v33 = vrot.slane %v330_v13, 4 }
 0x14b   : > { %v1528_v32 = vunpack.i.h.bf16 %v2097_v22 }
 0x14c   : > { %v742_v36 = vsel %vm738_vm8, %v305_v31, %v683_v33  ;;  %v2136_v55 = vpop.permute.xlu0 %1495  ;;  %v1493_v31 = vunpack.i.h.bf16 %v2134_v54  ;;  %v1527_v33 = vunpack.i.l.bf16 %v2097_v22 }
 0x14d   : > { %1610 = vrot.lane.b32.xlu1 %v1917_v15, %s1784_s8  ;;  %686 = vrot.lane.b32.xlu0 %v1911_v14, %s1782_s13  ;;  %v278_v14 = vsel %vm2414_vm2, %v1873_v8, 0.0 }
 0x14e   : > { %v1531_v29 = vpop.permute.xlu1 %1530 }
 0x14f   : > { %v1533_v59 = vunpack.i.h.bf16 %v1531_v29  ;;  %v1532_v30 = vunpack.i.l.bf16 %v1531_v29 }
 0x150   : > { %v1511_v61 = vpop.permute.xlu0 %1510 }
 0x151   : > { %419 = vrot.lane.b32.xlu1 %v1876_v9, %s1783_s14  ;;  %432 = vrot.lane.b32.xlu0 %v1876_v9, %s1784_s8  ;;  %v677_v34 = vsel %vm675_vm0, %v1532_v30, %v1533_v59  ;;  %v676_v37 = vsel %vm675_vm0, %v670_v5, %v1532_v30  ;;  %vm349_vm0 = vcmask 900096   ;;  %v1513_v29 = vunpack.i.h.bf16 %v1511_v61 }
 0x152   : > { %v740_v43 = vsel %vm738_vm8, %v278_v14, %v677_v34  ;;  %v739_v45 = vsel %vm738_vm8, %v277_v35, %v676_v37  ;;  %v351_v13 = vsel %vm349_vm0, %v1517_v16, %v1518_v12  ;;  %v1512_v27 = vunpack.i.l.bf16 %v1511_v61 }
 0x153   : > { %v1052_v48 = vpack.c.bf16 %v742_v36, %v740_v43  ;;  %v1051_v44 = vpack.c.bf16 %v741_v47, %v739_v45  ;;  %v1497_v14 = vunpack.i.l.bf16 %v2136_v55  ;;  %v2183_v45 = vsel %vm334_vm14, %v351_v13, 0.0 }
 0x154   : > { %v1521_v62 = vpop.permute.xlu0 %1520 }
 0x155   : > { %1615 = vrot.lane.b32.xlu1 %v1917_v15, %s1785_s22  ;;  %406 = vrot.lane.b32.xlu0 %v1876_v9, %s1785_s22  ;;  %v1523_v2 = vunpack.i.h.bf16 %v1521_v62  ;;  %v1522_v38 = vunpack.i.l.bf16 %v1521_v62 }
 0x156   : > { %1091 = vmatprep.subr.bf16.mxu0 %v1052_v48  ;;  %v400_v48 = vsel %vm399_vm15, %v394_v52, %v1512_v27  ;;  %v2202_v52 = vsel %vm464_vm9, %v1497_v14, %v1527_v33 }
 0x157   : > { %1092 = vmatpush1.bf16.msra.mxu0 %v1051_v44  ;;  %v875_v5 = vsel %vm873_vm1, %v1522_v38, %v1523_v2  ;;  %v401_v44 = vsel %vm399_vm15, %v1512_v27, %v1513_v29  ;;  %vm374_vm15 = vcmask 883712  }
 0x159   : > { %1620 = vrot.lane.b32.xlu1 %v1917_v15, %s1786_s23  ;;  %1625 = vrot.lane.b32.xlu0 %v1624_v51, %s1780_s11 }
 0x15d   : > { %1630 = vrot.lane.b32.xlu1 %v1917_v15, %s1787_s24  ;;  %709 = vrot.lane.b32.xlu0 %v1876_v9, %s1786_s23 }
 0x161   : > { %484 = vrot.lane.b32.xlu1 %v1876_v9, %s1787_s24  ;;  %1635 = vrot.lane.b32.xlu0 %v1917_v15, %s1788_s25 }
 0x165   : > { %1640 = vrot.lane.b32.xlu1 %v1917_v15, %s1789_s26  ;;  %445 = vrot.lane.b32.xlu0 %v1876_v9, %s1788_s25 }
 0x169   : > { %471 = vrot.lane.b32.xlu1 %v1876_v9, %s1789_s26 }
 0x187   : > { %v2140_v56 = vpop.permute.xlu0 %1535 }
 0x188   : > { %v1537_v59 = vunpack.i.l.bf16 %v2140_v56 }
 0x193   : > { %v2153_v18 = vpop.permute.xlu0 %1540 }
 0x194   : > { %v1543_v61 = vunpack.i.h.bf16 %v2153_v18  ;;  %v1542_v62 = vunpack.i.l.bf16 %v2153_v18 }
 0x19b   : > { %v2138_v1 = vpop.permute.xlu1 %1545 }
 0x19c   : > { %v1547_v12 = vunpack.i.l.bf16 %v2138_v1 }
 0x19f   : > { %v2142_v3 = vpop.permute.xlu1 %1550 }
 0x1a0   : > { %v1553_v15 = vunpack.i.h.bf16 %v2142_v3  ;;  %v1552_v4 = vunpack.i.l.bf16 %v2142_v3 }
 0x1a2   : > { %v863_v53 = vsel %vm2415_vm12, %v1552_v4, %v1553_v15  ;;  %v939_v6 = vsel %vm738_vm8, %v1553_v15, %v1523_v2  ;;  %vm817_vm12 = vcmask 916480  }
 0x1a3   : > { %v2155_v19 = vpop.permute.xlu1 %1565  ;;  %v938_v21 = vsel %vm738_vm8, %v863_v53, %v875_v5  ;;  %v818_v47 = vsel %vm817_vm12, %v2084_v39, %v1492_v24  ;;  %v819_v15 = vsel %vm817_vm12, %v1492_v24, %v1493_v31  ;;  %v2199_v39 = vsel %vm464_vm9, %v1527_v33, %v1528_v32 }
 0x1a4   : > { %v1644_v20 = vpack.i.bf16 %v939_v6, %v938_v21  ;;  %v1567_v23 = vunpack.i.l.bf16 %v2155_v19  ;;  %v1568_v51 = vunpack.i.h.bf16 %v2155_v19  ;;  %v2207_v5 = vsel %vm2413_vm3, %v400_v48, 0.0 }
 0x1a5   : > { %v2211_v53 = vsel %vm386_vm4, %v401_v44, 0.0  ;;  %v874_v6 = vsel %vm873_vm1, %v2074_v46, %v1522_v38  ;;  %vm2416_vm12 = vcmask 416768  }
 0x1a6   : > { %1645 = vrot.lane.b32.xlu1 %v1644_v20, %s1790_s27  ;;  %v922_v34 = vsel %vm738_vm8, %v1876_v9, %v1567_v23  ;;  %v1538_v9 = vunpack.i.h.bf16 %v2140_v56  ;;  %v763_v21 = vsel %vm2416_vm12, %v1567_v23, %v1568_v51  ;;  %vm2417_vm10 = vmmov %vm2416_vm12  ;;  %v937_v23 = vsel %vm738_vm8, %v1552_v4, %v874_v6 }
 0x1a7   : > { %v2161_v42 = vpop.permute.xlu1 %1570  ;;  %v2163_v28 = vpop.permute.xlu0 %1555  ;;  %vm2418_vm3 = vmmov %vm2417_vm10  ;;  %v1548_v4 = vunpack.i.h.bf16 %v2138_v1  ;;  %v700_v17 = vrot.slane %v2211_v53, 4 }
 0x1a8   : > { %v1572_v30 = vunpack.i.l.bf16 %v2161_v42  ;;  %v1573_v2 = vunpack.i.h.bf16 %v2161_v42  ;;  %v773_v13 = vsel %vm2417_vm10, %v1537_v59, %v1538_v9  ;;  %v795_v29 = vsel %vm2418_vm3, %v1542_v62, %v1543_v61  ;;  %vm2419_vm2 = vmmov %vm2418_vm3 }
 0x1a9   : > { %vm692_vm3 = vcmask 891904   ;;  %vm2420_vm10 = vmmov %vm2419_vm2 }
 0x1aa   : > { %v925_v35 = vsel %vm738_vm8, %v1537_v59, %v1572_v30  ;;  %v785_v27 = vsel %vm2419_vm2, %v1572_v30, %v1573_v2  ;;  %v923_v59 = vsel %vm738_vm8, %v1873_v8, %v763_v21  ;;  %v924_v30 = vsel %vm738_vm8, %v1870_v7, %v1568_v51  ;;  %vm2421_vm1 = vmmov %vm2419_vm2 }
 0x1ab   : > { %v2177_v37 = vpop.permute.xlu1 %1575  ;;  %v2179_v43 = vpop.permute.xlu0 %1560  ;;  %v1649_v36 = vpack.i.bf16 %v925_v35, %v922_v34  ;;  %v926_v44 = vsel %vm738_vm8, %v773_v13, %v785_v27  ;;  %v927_v3 = vsel %vm738_vm8, %v1538_v9, %v1573_v2  ;;  %v1558_v8 = vunpack.i.h.bf16 %v2163_v28  ;;  %vm2422_vm12 = vmmov %vm2421_vm1 }
 0x1ac   : > { %v1577_v56 = vunpack.i.l.bf16 %v2177_v37  ;;  %v1578_v20 = vunpack.i.h.bf16 %v2177_v37  ;;  %v1557_v51 = vunpack.i.l.bf16 %v2163_v28  ;;  %v1669_v2 = vpack.i.bf16 %v927_v3, %v926_v44 }
 0x1ad   : > { %1650 = vrot.lane.b32.xlu0 %v1649_v36, %s1790_s27  ;;  %v1664_v1 = vpack.i.bf16 %v924_v30, %v923_v59 }
 0x1ae   : > { %v928_v14 = vsel %vm738_vm8, %v1542_v62, %v1577_v56  ;;  %v807_v48 = vsel %vm2420_vm10, %v1577_v56, %v1578_v20  ;;  %v1563_v56 = vunpack.i.h.bf16 %v2179_v43  ;;  %v930_v13 = vsel %vm738_vm8, %v1543_v61, %v1578_v20  ;;  %vm2423_vm10 = vmmov %vm2421_vm1 }
 0x1af   : > { %v1581_v18 = vpop.permute.xlu1 %1580  ;;  %v1586_v19 = vpop.permute.xlu0 %1585  ;;  %v885_v61 = vsel %vm2423_vm10, %v1557_v51, %v1558_v8  ;;  %vm715_vm10 = vcmask 760832  }
 0x1b0   : > { %v1582_v24 = vunpack.i.l.bf16 %v1581_v18  ;;  %v1587_v42 = vunpack.i.l.bf16 %v1586_v19  ;;  %v1583_v33 = vunpack.i.h.bf16 %v1581_v18  ;;  %v945_v3 = vsel %vm738_vm8, %v1563_v56, %v1528_v32 }
 0x1b2   : > { %v931_v46 = vsel %vm738_vm8, %v818_v47, %v1582_v24  ;;  %v934_v38 = vsel %vm738_vm8, %v1547_v12, %v1587_v42  ;;  %v1588_v47 = vunpack.i.h.bf16 %v1586_v19  ;;  %v831_v62 = vsel %vm2419_vm2, %v1582_v24, %v1583_v33  ;;  %vm2424_vm2 = vmmov %vm2421_vm1 }
 0x1b3   : > { %v344_v34 = vpop.permute.xlu1 %343  ;;  %v1591_v35 = vpop.permute.xlu0 %1590  ;;  %v1654_v37 = vpack.i.bf16 %v931_v46, %v928_v14  ;;  %v1659_v36 = vpack.i.bf16 %v937_v23, %v934_v38  ;;  %v1562_v19 = vunpack.i.l.bf16 %v2179_v43  ;;  %v929_v24 = vsel %vm738_vm8, %v795_v29, %v807_v48 }
 0x1b4   : > { %v1593_v6 = vunpack.i.h.bf16 %v1591_v35  ;;  %v1592_v18 = vunpack.i.l.bf16 %v1591_v35  ;;  %v853_v27 = vsel %vm2421_vm1, %v1587_v42, %v1588_v47  ;;  %v932_v46 = vsel %vm738_vm8, %v819_v15, %v831_v62 }
 0x1b5   : > { %1655 = vrot.lane.b32.xlu1 %v1654_v37, %s1790_s27  ;;  %1660 = vrot.lane.b32.xlu0 %v1659_v36, %s1790_s27  ;;  %v933_v28 = vsel %vm738_vm8, %v1493_v31, %v1583_v33  ;;  %v699_v38 = vrot.slane %v2207_v5, 4  ;;  %v841_v43 = vsel %vm2422_vm12, %v1547_v12, %v1548_v4  ;;  %v907_v20 = vsel %vm2424_vm2, %v1562_v19, %v1563_v56 }
 0x1b6   : > { %v376_v35 = vsel %vm374_vm15, %v1592_v18, %v1593_v6  ;;  %v350_v54 = vsel %vm349_vm0, %v344_v34, %v1517_v16  ;;  %v1674_v31 = vpack.i.bf16 %v930_v13, %v929_v24  ;;  %v1679_v42 = vpack.i.bf16 %v933_v28, %v932_v46  ;;  %vm2425_vm0 = vmmov %vm2421_vm1 }
 0x1b7   : > { %v1596_v21 = vpop.permute.xlu1 %1595  ;;  %v369_v9 = vpop.permute.xlu0 %368  ;;  %v935_v29 = vsel %vm738_vm8, %v841_v43, %v853_v27  ;;  %v936_v33 = vsel %vm738_vm8, %v1548_v4, %v1588_v47  ;;  %v380_v30 = vsel %vm361_vm11, %v376_v35, 0.0  ;;  %v943_v34 = vsel %vm738_vm8, %v1562_v19, %v2202_v52 }
 0x1b8   : > { %v1597_v14 = vunpack.i.l.bf16 %v1596_v21  ;;  %v1598_v23 = vunpack.i.h.bf16 %v1596_v21  ;;  %v375_v15 = vsel %vm374_vm15, %v369_v9, %v1592_v18  ;;  %v944_v48 = vsel %vm738_vm8, %v907_v20, %v2199_v39 }
 0x1b9   : > { %1670 = vrot.lane.b32.xlu1 %v1669_v2, %s1790_s27  ;;  %1665 = vrot.lane.b32.xlu0 %v1664_v1, %s1790_s27  ;;  %v354_v47 = vsel %vm333_vm5, %v350_v54, 0.0  ;;  %v379_v44 = vsel %vm360_vm13, %v375_v15, 0.0  ;;  %v1684_v18 = vpack.i.bf16 %v936_v33, %v935_v29  ;;  %v746_v39 = vsel %vm738_vm8, %v380_v30, %v700_v17 }
 0x1ba   : > { %v940_v59 = vsel %vm738_vm8, %v1557_v51, %v1597_v14  ;;  %v897_v16 = vsel %vm2425_vm0, %v1597_v14, %v1598_v23  ;;  %v942_v9 = vsel %vm738_vm8, %v1558_v8, %v1598_v23  ;;  %v745_v32 = vsel %vm738_vm8, %v379_v44, %v699_v38  ;;  %v1712_v8 = vld [vmem:[%s2405_s1 + $0x4] ss:$8 sps:$4 sm:$0xff]  }
 0x1bb   : > { %v1601_v5 = vpop.permute.xlu1 %1600  ;;  %v1606_v12 = vpop.permute.xlu0 %1605  ;;  %v1694_v6 = vpack.i.bf16 %v943_v34, %v940_v59  ;;  %v941_v21 = vsel %vm738_vm8, %v885_v61, %v897_v16  ;;  %vm1080_vm15 = vcmask 31744   ;;  %vm425_vm1 = vcmask 769024  }
 0x1bc   : > { %v1603_v37 = vunpack.i.h.bf16 %v1601_v5  ;;  %v1602_v36 = vunpack.i.l.bf16 %v1601_v5  ;;  %v1704_v27 = vpack.i.bf16 %v942_v9, %v941_v21  ;;  %v1608_v14 = vunpack.i.h.bf16 %v1606_v12  ;;  %1338 = vmatprep.mubr.msk.bf16.mxu0 %vm1080_vm15, %v1712_v8 }
 0x1bd   : > { %1675 = vrot.lane.b32.xlu1 %v1674_v31, %s1790_s27  ;;  %1680 = vrot.lane.b32.xlu0 %v1679_v42, %s1790_s27  ;;  %v1607_v46 = vunpack.i.l.bf16 %v1606_v12  ;;  %vm412_vm12 = vcmask 777216   ;;  %vm2426_vm2 = vcmp.ge.s32.totalorder %v2001_v0, 0  ;;  %vm477_vm0 = vcmask 646144  }
 0x1be   : > { %v694_v53 = vsel %vm692_vm3, %v1602_v36, %v1603_v37  ;;  %vm2427_vm15 = vcmp.ge.s32.totalorder %v1999_v63, 0 }
 0x1bf   : > { %v1611_v4 = vpop.permute.xlu1 %1610  ;;  %v687_v62 = vpop.permute.xlu0 %686  ;;  %v744_v52 = vsel %vm738_vm8, %v2183_v45, %v694_v53  ;;  %v1689_v45 = vpack.i.bf16 %v945_v3, %v944_v48  ;;  %v427_v35 = vsel %vm425_vm1, %v1607_v46, %v1608_v14 }
 0x1c0   : > { %v693_v51 = vsel %vm692_vm3, %v687_v62, %v1602_v36  ;;  %v1054_v19 = vpack.c.bf16 %v746_v39, %v744_v52  ;;  %v1613_v2 = vunpack.i.h.bf16 %v1611_v4  ;;  %v1612_v1 = vunpack.i.l.bf16 %v1611_v4 }
 0x1c1   : > { %v743_v22 = vsel %vm738_vm8, %v354_v47, %v693_v51  ;;  %1695 = vrot.lane.b32.xlu1 %v1694_v6, %s1790_s27  ;;  %1685 = vrot.lane.b32.xlu0 %v1684_v18, %s1790_s27  ;;  %vm438_vm3 = vcmask 752640   ;;  %v431_v12 = vsel %vm334_vm14, %v427_v35, 0.0  ;;  %v1498_v52 = vunpack.i.h.bf16 %v2136_v55 }
 0x1c2   : > { %1093 = vmatprep.subr.bf16.mxu0 %v1054_v19  ;;  %v1053_v56 = vpack.c.bf16 %v745_v32, %v743_v22  ;;  %v440_v28 = vsel %vm438_vm3, %v1612_v1, %v1613_v2  ;;  %v706_v59 = vrot.slane %v431_v12, 4 }
 0x1c3   : > { %v420_v24 = vpop.permute.xlu1 %419  ;;  %v433_v13 = vpop.permute.xlu0 %432  ;;  %v444_v31 = vsel %vm361_vm11, %v440_v28, 0.0  ;;  %vm490_vm11 = vcmask 637952  }
 0x1c4   : > { %1094 = vmatpush1.bf16.msra.mxu0 %v1053_v56  ;;  %v426_v23 = vsel %vm425_vm1, %v420_v24, %v1607_v46  ;;  %v439_v54 = vsel %vm438_vm3, %v433_v13, %v1612_v1  ;;  %v723_v50 = vrot.slane %v444_v31, 4 }
 0x1c5   : > { %1705 = vrot.lane.b32.xlu1 %v1704_v27, %s1790_s27  ;;  %1690 = vrot.lane.b32.xlu0 %v1689_v45, %s1790_s27  ;;  %v430_v5 = vsel %vm333_vm5, %v426_v23, 0.0  ;;  %v443_v33 = vsel %vm360_vm13, %v439_v54, 0.0  ;;  %vm451_vm13 = vcmask 744448  }
 0x1c6   : > { %v705_v17 = vrot.slane %v430_v5, 4  ;;  %v722_v16 = vrot.slane %v443_v33, 4 }
 0x1c7   : > { %v1616_v38 = vpop.permute.xlu1 %1615  ;;  %v407_v43 = vpop.permute.xlu0 %406 }
 0x1c8   : > { %v1618_v61 = vunpack.i.h.bf16 %v1616_v38  ;;  %v1617_v20 = vunpack.i.l.bf16 %v1616_v38 }
 0x1c9   : > { %657 = vrot.lane.b32.xlu1 %v1870_v7, %s1791_s5  ;;  %1700 = vrot.lane.b32.xlu0 %v1881_v10, %s1791_s5 }
 0x1ca   : > { %v414_v15 = vsel %vm412_vm12, %v1617_v20, %v1618_v61  ;;  %v413_v7 = vsel %vm412_vm12, %v407_v43, %v1617_v20 }
 0x1cb   : > { %v1621_v42 = vpop.permute.xlu1 %1620  ;;  %v1626_v29 = vpop.permute.xlu0 %1625  ;;  %v418_v36 = vsel %vm309_vm7, %v414_v15, 0.0  ;;  %v417_v34 = vsel %vm308_vm6, %v413_v7, 0.0 }
 0x1cc   : > { %v1623_v10 = vunpack.i.h.bf16 %v1621_v42  ;;  %v1622_v37 = vunpack.i.l.bf16 %v1621_v42  ;;  %v1627_v44 = vunpack.i.l.bf16 %v1626_v29  ;;  %v748_v4 = vsel %vm738_vm8, %v418_v36, %v706_v59 }
 0x1cd   : > { %v1628_v62 = vunpack.i.h.bf16 %v1626_v29  ;;  %v747_v51 = vsel %vm738_vm8, %v417_v34, %v705_v17 }
 0x1ce   : > { %v717_v30 = vsel %vm715_vm10, %v1622_v37, %v1623_v10  ;;  %v466_v22 = vsel %vm464_vm9, %v1498_v52, %v1627_v44 }
 0x1cf   : > { %v1631_v48 = vpop.permute.xlu1 %1630  ;;  %v710_v47 = vpop.permute.xlu0 %709  ;;  %v750_v57 = vsel %vm738_vm8, %v717_v30, %v723_v50  ;;  %v465_v2 = vsel %vm464_vm9, %v1628_v62, %v1498_v52  ;;  %v470_v24 = vsel %vm2426_vm2, %v466_v22, 0.0  ;;  %vm2428_vm9 = vcmp.lt.s32.totalorder %v1945_v25, 16 }
 0x1d0   : > { %v1633_v53 = vunpack.i.h.bf16 %v1631_v48  ;;  %v1632_v3 = vunpack.i.l.bf16 %v1631_v48  ;;  %v716_v6 = vsel %vm715_vm10, %v710_v47, %v1622_v37  ;;  %v1056_v18 = vpack.c.bf16 %v750_v57, %v748_v4 }
 0x1d1   : > { %v749_v39 = vsel %vm738_vm8, %v716_v6, %v722_v16  ;;  %v469_v14 = vsel %vm2427_vm15, %v465_v2, 0.0  ;;  %v729_v23 = vrot.slane %v470_v24, 4 }
 0x1d2   : > { %1095 = vmatprep.subr.bf16.mxu0 %v1056_v18  ;;  %v1055_v9 = vpack.c.bf16 %v749_v39, %v747_v51  ;;  %v492_v32 = vsel %vm490_vm11, %v1632_v3, %v1633_v53  ;;  %v728_v61 = vrot.slane %v469_v14, 4 }
 0x1d3   : > { %v485_v19 = vpop.permute.xlu1 %484  ;;  %v1636_v21 = vpop.permute.xlu0 %1635  ;;  %v496_v13 = vsel %vm334_vm14, %v492_v32, 0.0  ;;  %vm1084_vm14 = vcmask 1041408  }
 0x1d4   : > { %v1638_v56 = vunpack.i.h.bf16 %v1636_v21  ;;  %v1637_v45 = vunpack.i.l.bf16 %v1636_v21  ;;  %1096 = vmatpush1.bf16.msra.mxu0 %v1055_v9  ;;  %v491_v1 = vsel %vm490_vm11, %v485_v19, %v1632_v3  ;;  %v735_v35 = vrot.slane %v496_v13, 4 }
 0x1d5   : > { %v495_v43 = vsel %vm333_vm5, %v491_v1, 0.0  ;;  %vm2430_vm5 = vcmp.lt.s32.totalorder %v1993_v60, 16 }
 0x1d6   : > { %v453_v55 = vsel %vm451_vm13, %v1637_v45, %v1638_v56  ;;  %v734_v31 = vrot.slane %v495_v43, 4 }
 0x1d7   : > { %v1641_v27 = vpop.permute.xlu1 %1640  ;;  %v446_v8 = vpop.permute.xlu0 %445  ;;  %v457_v0 = vsel %vm386_vm4, %v453_v55, 0.0  ;;  %vm1018_vm4 = vcmask 629760  }
 0x1d8   : > { %v1643_v46 = vunpack.i.h.bf16 %v1641_v27  ;;  %v1642_v28 = vunpack.i.l.bf16 %v1641_v27  ;;  %v452_v38 = vsel %vm451_vm13, %v446_v8, %v1637_v45  ;;  %v752_v5 = vsel %vm738_vm8, %v457_v0, %v729_v23 }
 0x1d9   : > { %v456_v20 = vsel %vm2428_vm9, %v452_v38, 0.0 }
 0x1da   : > { %v479_v58 = vsel %vm477_vm0, %v1642_v28, %v1643_v46  ;;  %v751_v42 = vsel %vm738_vm8, %v456_v20, %v728_v61 }
 0x1db   : > { %v472_v54 = vpop.permute.xlu1 %471  ;;  %v483_v63 = vsel %vm309_vm7, %v479_v58, 0.0  ;;  %vm2429_vm7 = vcmp.lt.s32.totalorder %v1973_v49, 16 }
 0x1dc   : > { %v478_v15 = vsel %vm477_vm0, %v472_v54, %v1642_v28  ;;  %v754_v11 = vsel %vm738_vm8, %v483_v63, %v735_v35 }
 0x1dd   : > { %v482_v26 = vsel %vm308_vm6, %v478_v15, 0.0  ;;  %v1058_v12 = vpack.c.bf16 %v754_v11, %v752_v5  ;;  %vm659_vm6 = vcmask 211968  }
 0x1de   : > { %v753_v29 = vsel %vm738_vm8, %v482_v26, %v734_v31  ;;  %vm1144_vm8 = vcmask 7168  }
 0x1df   : > { %1097 = vmatprep.subr.bf16.mxu0 %v1058_v12  ;;  %v1057_v25 = vpack.c.bf16 %v753_v29, %v751_v42 }
 0x1e1   : > { %1098 = vmatpush1.bf16.msra.mxu0 %v1057_v25 }
 0x218   : > { %v1646_v33 = vpop.permute.xlu1 %1645 }
 0x219   : > { %v1648_v19 = vunpack.i.h.bf16 %v1646_v33  ;;  %v1647_v21 = vunpack.i.l.bf16 %v1646_v33 }
 0x21b   : > { %v1030_v46 = vsel %vm1018_vm4, %v1647_v21, %v1648_v19 }
 0x21f   : > { %v1651_v41 = vpop.permute.xlu0 %1650 }
 0x220   : > { %v1653_v37 = vunpack.i.h.bf16 %v1651_v41  ;;  %v1652_v50 = vunpack.i.l.bf16 %v1651_v41 }
 0x227   : > { %v1656_v7 = vpop.permute.xlu1 %1655  ;;  %v1661_v10 = vpop.permute.xlu0 %1660 }
 0x228   : > { %v1658_v44 = vunpack.i.h.bf16 %v1656_v7  ;;  %v1657_v53 = vunpack.i.l.bf16 %v1656_v7  ;;  %v1663_v9 = vunpack.i.h.bf16 %v1661_v10  ;;  %v1662_v13 = vunpack.i.l.bf16 %v1661_v10 }
 0x22a   : > { %v1029_v38 = vsel %vm1018_vm4, %v1663_v9, %v1647_v21 }
 0x22b   : > { %v1671_v36 = vpop.permute.xlu1 %1670  ;;  %v1666_v59 = vpop.permute.xlu0 %1665 }
 0x22c   : > { %v1673_v30 = vunpack.i.h.bf16 %v1671_v36  ;;  %v1672_v17 = vunpack.i.l.bf16 %v1671_v36  ;;  %v1668_v40 = vunpack.i.h.bf16 %v1666_v59  ;;  %v1667_v16 = vunpack.i.l.bf16 %v1666_v59 }
 0x22e   : > { %v1020_v34 = vsel %vm1018_vm4, %v1667_v16, %v1668_v40  ;;  %v1022_v48 = vsel %vm1018_vm4, %v1672_v17, %v1673_v30  ;;  %v1019_v47 = vsel %vm1018_vm4, %v1652_v50, %v1667_v16  ;;  %v1021_v57 = vsel %vm1018_vm4, %v1653_v37, %v1672_v17  ;;  %v1710_v17 = vld [vmem:[%s2405_s1] ss:$8 sps:$4 sm:$0xff]  }
 0x22f   : > { %v1676_v3 = vpop.permute.xlu1 %1675  ;;  %v1681_v4 = vpop.permute.xlu0 %1680  ;;  %v1060_v62 = vpack.c.bf16 %v1022_v48, %v1020_v34  ;;  %v1059_v6 = vpack.c.bf16 %v1021_v57, %v1019_v47 }
 0x230   : > { %v1678_v18 = vunpack.i.h.bf16 %v1676_v3  ;;  %v1677_v52 = vunpack.i.l.bf16 %v1676_v3  ;;  %v1683_v39 = vunpack.i.h.bf16 %v1681_v4  ;;  %v1682_v51 = vunpack.i.l.bf16 %v1681_v4 }
 0x231   : > { %1099 = vmatprep.subr.bf16.mxu0 %v1060_v62  ;;  %v1134_v62 = vld [vmem:[#allocation2] sm:$0xff] }
 0x232   : > { %1100 = vmatpush1.bf16.msra.mxu0 %v1059_v6  ;;  %v1024_v22 = vsel %vm1018_vm4, %v1677_v52, %v1678_v18  ;;  %v1026_v32 = vsel %vm1018_vm4, %v1682_v51, %v1683_v39  ;;  %v1023_v56 = vsel %vm1018_vm4, %v1657_v53, %v1677_v52  ;;  %v1025_v45 = vsel %vm1018_vm4, %v1658_v44, %v1682_v51  ;;  %v1135_v18 = vld [vmem:[#allocation2 + $0x8] sm:$0xff]  ;;  %v1147_v51 = vld [vmem:[#allocation3] sm:$0xff] }
 0x233   : > { %v1696_v2 = vpop.permute.xlu1 %1695  ;;  %v1686_v1 = vpop.permute.xlu0 %1685  ;;  %v1062_v55 = vpack.c.bf16 %v1026_v32, %v1024_v22  ;;  %v1061_v24 = vpack.c.bf16 %v1025_v45, %v1023_v56  ;;  %v1148_v22 = vld [vmem:[#allocation3 + $0x8] sm:$0xff] }
 0x234   : > { %v1688_v27 = vunpack.i.h.bf16 %v1686_v1  ;;  %v1687_v8 = vunpack.i.l.bf16 %v1686_v1  ;;  %v1698_v43 = vunpack.i.h.bf16 %v1696_v2  ;;  %v1697_v0 = vunpack.i.l.bf16 %v1696_v2 }
 0x235   : > { %1101 = vmatprep.subr.bf16.mxu0 %v1062_v55 }
 0x236   : > { %1102 = vmatpush1.bf16.msra.mxu0 %v1061_v24  ;;  %v1028_v14 = vsel %vm1018_vm4, %v1687_v8, %v1688_v27  ;;  %v1027_v28 = vsel %vm1018_vm4, %v1662_v13, %v1687_v8 }
 0x237   : > { %v1706_v23 = vpop.permute.xlu1 %1705  ;;  %v1691_v35 = vpop.permute.xlu0 %1690  ;;  %v1064_v58 = vpack.c.bf16 %v1030_v46, %v1028_v14  ;;  %v1063_v61 = vpack.c.bf16 %v1029_v38, %v1027_v28 }
 0x238   : > { %v1708_v20 = vunpack.i.h.bf16 %v1706_v23  ;;  %v1707_v54 = vunpack.i.l.bf16 %v1706_v23  ;;  %v1693_v63 = vunpack.i.h.bf16 %v1691_v35  ;;  %v1692_v31 = vunpack.i.l.bf16 %v1691_v35 }
 0x239   : > { %1103 = vmatprep.subr.bf16.mxu0 %v1064_v58 }
 0x23a   : > { %1104 = vmatpush1.bf16.msra.mxu0 %v1063_v61  ;;  %v1032_v15 = vsel %vm1018_vm4, %v1707_v54, %v1708_v20  ;;  %v1034_v5 = vsel %vm1018_vm4, %v1692_v31, %v1693_v63  ;;  %v1031_v11 = vsel %vm1018_vm4, %v1697_v0, %v1707_v54  ;;  %v1033_v26 = vsel %vm1018_vm4, %v1698_v43, %v1692_v31 }
 0x23b   : > { %v1701_v12 = vpop.permute.xlu0 %1700  ;;  %v1066_v42 = vpack.c.bf16 %v1034_v5, %v1032_v15  ;;  %v1065_v29 = vpack.c.bf16 %v1033_v26, %v1031_v11  ;;  %v658_v41 = vpop.permute.xlu1 %657 }
 0x23c   : > { %v1703_v25 = vunpack.i.h.bf16 %v1701_v12  ;;  %v1702_v33 = vunpack.i.l.bf16 %v1701_v12 }
 0x23d   : > { %1105 = vmatprep.subr.bf16.mxu0 %v1066_v42 }
 0x23e   : > { %v661_v7 = vsel %vm659_vm6, %v1703_v25, %v658_v41  ;;  %1106 = vmatpush1.bf16.msra.mxu0 %v1065_v29  ;;  %v660_v10 = vsel %vm659_vm6, %v1702_v33, %v1703_v25 }
 0x23f   : > { %v665_v37 = vsel %vm2429_vm7, %v661_v7, 0.0  ;;  %v664_v50 = vsel %vm2430_vm5, %v660_v10, 0.0 }
 0x240   : > { %v1068_v36 = vpack.c.bf16 %v665_v37, %v665_v37  ;;  %v1067_v59 = vpack.c.bf16 %v664_v50, %v664_v50 }
 0x242   : > { %1337 = vmatprep.subr.msk.bf16.mxu0 %vm1084_vm14, %v1068_v36  ;;  %v1086_v30 = vsel %vm1084_vm14, %v1067_v59, 0 }
 0x243   : > { %1108 = vmatpush1.bf16.msra.mxu0 %v1086_v30 }
 0x246   : > { %1124 = vmatmul.mubr.bf16.vlgmr.msra.gmra.mrb[0].mxu0 %v1710_v17 }
 0x319   : > { %v1125_v40 = vpop.f32.mrb[0].mxu0 }
 0x31a   : > { %1166 = vst [vmem:[%s1165_s10] sm:$0xff] %v1125_v40  ;;  %1170 = vst [vmem:[%s1862_s29] sm:$0xff] %v1125_v40  ;;  %v1127_v49 = vpop.f32.mrb[1].mxu0  ;;  %v1149_v60 = vmul.f32 %v1125_v40, %v1125_v40 }
 0x31b   : > { %1167 = vst [vmem:[%s1165_s10 + $0x8] sm:$0xff] %v1127_v49  ;;  %1171 = vst [vmem:[%s1862_s29 + $0x8] sm:$0xff] %v1127_v49  ;;  %v1129_v16 = vpop.f32.mrb[2].mxu0  ;;  %v1136_v34 = vadd.f32 %v1127_v49, %v1125_v40  ;;  %v1150_v48 = vmul.f32 %v1127_v49, %v1127_v49 }
 0x31c   : > { %1168 = vst [vmem:[%s1165_s10 + $0x10] sm:$0xff] %v1129_v16  ;;  %1172 = vst [vmem:[%s1862_s29 + $0x10] sm:$0xff] %v1129_v16  ;;  %v1131_v47 = vpop.f32.mrb[3].mxu0  ;;  %v1151_v57 = vmul.f32 %v1129_v16, %v1129_v16 }
 0x31d   : > { %1169 = vst [vmem:[%s1165_s10 + $0x18] sm:$0xff] %v1131_v47  ;;  %1173 = vst [vmem:[%s1862_s29 + $0x18] sm:$0xff] %v1131_v47  ;;  %1137 = vadd.xlane.f32.xlu0 %v1136_v34  ;;  %v1139_v44 = vadd.f32 %v1131_v47, %v1129_v16  ;;  %v1153_v53 = vadd.f32 %v1150_v48, %v1149_v60  ;;  %v1152_v3 = vmul.f32 %v1131_v47, %v1131_v47 }
 0x31f   : > { %1140 = vadd.xlane.f32.xlu1 %v1139_v44  ;;  %v1156_v4 = vadd.f32 %v1152_v3, %v1151_v57 }
 0x321   : > { %1154 = vadd.xlane.f32.xlu0 %v1153_v53 }
 0x325   : > { %1157 = vadd.xlane.f32.xlu0 %v1156_v4 }
 0x3aa   : > { %v1138_v6 = vpop.xlane.xlu0 %1137 }
 0x3ab   : > { %v1142_v52 = vadd.f32 %v1138_v6, %v1134_v62 }
 0x3ac   : > { %v1141_v39 = vpop.xlane.xlu1 %1140 }
 0x3ad   : > { %1145 = vst.msk [vmem:[#allocation2] sm:$0xff] %vm1144_vm8, %v1142_v52  ;;  %v1143_v19 = vadd.f32 %v1141_v39, %v1135_v18 }
 0x3ae   : > { %v1155_v21 = vpop.xlane.xlu0 %1154 }
 0x3af   : > { %1146 = vst.msk [vmem:[#allocation2 + $0x8] sm:$0xff] %vm1144_vm8, %v1143_v19  ;;  %v1159_v9 = vadd.f32 %v1155_v21, %v1147_v51 }
 0x3b1   : > { %1161 = vst.msk [vmem:[#allocation3] sm:$0xff] %vm1144_vm8, %v1159_v9 }
 0x3b2   : > { %v1158_v32 = vpop.xlane.xlu0 %1157 }
 0x3b3   : > { %v1160_v56 = vadd.f32 %v1158_v32, %v1148_v22 }
 0x3b5   : > { %1162 = vst.msk [vmem:[#allocation3 + $0x8] sm:$0xff] %vm1144_vm8, %v1160_v56 }
 0x3b6 PF: > { %p1341_p11 = scmp.ne.s32.totalorder %s1745_s16, 1 }
 0x3b7   : > { %v1178_v45 = vld [vmem:[#allocation2] sm:$0xff] (!%p1341_p11)  ;;  %v1792_v1 = vmov (!%p1341_p11), 0   ;;  %v1179_v13 = vld [vmem:[#allocation2 + $0x8] sm:$0xff] (!%p1341_p11)  ;;  %s1349_s24 = sshll.u32 (!%p1341_p11), %s1741_s15, 5 }
 0x3b8   : > { %1177 = sbr.rel (%p1341_p11) target bundleno = 1115 (0x45b), region = 48  ;;  %v1182_v2 = vld [vmem:[#allocation3] sm:$0xff] (!%p1341_p11)  ;;  %1713 = vset.pattern.permute.xlu0 (!%p1341_p11), %v1792_v1  ;;  %v1180_v55 = vmul.f32 (!%p1341_p11), 0.001953125, %v1178_v45  ;;  %1714 = vset.pattern.permute.xlu1 (!%p1341_p11), %v1792_v1  ;;  %v1181_v8 = vmul.f32 (!%p1341_p11), 0.001953125, %v1179_v13  ;;  %v1190_v35 = vld [vmem:[%s2406_s2] sm:$0xff] (!%p1341_p11)  ;;  %v1191_v58 = vld [vmem:[%s2406_s2 + $0x8] sm:$0xff] (!%p1341_p11) }
 0x3b9   : > { %v1184_v24 = vmul.f32 (!%p1341_p11), 0.001953125, %v1182_v2  ;;  %v1198_v31 = vld [vmem:[%s2407_s3] sm:$0xff] (!%p1341_p11)  ;;  %v1199_v5 = vld [vmem:[%s2407_s3 + $0x8] sm:$0xff] (!%p1341_p11)  ;;  %s1206_s25 = scalar_lea.vmem (!%p1341_p11), [#allocation4], %s1349_s24 }
 0x3ba   : > { %v1186_v46 = vmul.f32 (!%p1341_p11), %v1180_v55, %v1180_v55  ;;  %v1187_v28 = vmul.f32 (!%p1341_p11), %v1181_v8, %v1181_v8  ;;  %v1207_v42 = vld [vmem:[%s1206_s25] sm:$0xff] (!%p1341_p11)  ;;  %v1208_v29 = vld [vmem:[%s1206_s25 + $0x8] sm:$0xff] (!%p1341_p11)  ;;  %v1209_v7 = vld [vmem:[%s1206_s25 + $0x10] sm:$0xff] (!%p1341_p11) }
 0x3bb   : > { %v1210_v10 = vld [vmem:[%s1206_s25 + $0x18] sm:$0xff] (!%p1341_p11) }
 0x3bc   : > { %v1183_v27 = vld [vmem:[#allocation3 + $0x8] sm:$0xff] (!%p1341_p11)  ;;  %v1188_v38 = vsub.f32 (!%p1341_p11), %v1184_v24, %v1186_v46 }
 0x3bd   : > { %v1185_v14 = vmul.f32 (!%p1341_p11), 0.001953125, %v1183_v27 }
 0x3be   : > { %v1192_v0 = vadd.f32 (!%p1341_p11), 1e-05, %v1188_v38 }
 0x3bf   : > { %v1189_v43 = vsub.f32 %v1185_v14, %v1187_v28 }
 0x3c0   : > { %1715 = vrsqrt.f32 %v1192_v0 }
 0x3c1   : > { %v1193_v23 = vadd.f32 1e-05, %v1189_v43 }
 0x3c3   : > { %1717 = vrsqrt.f32 %v1193_v23 }
 0x3ca   : > { %v1716_v61 = vpop.eup %1715 }
 0x3cb   : > { %v1196_v54 = vmul.f32 %v1716_v61, %v1190_v35 }
 0x3cd   : > { %v1718_v20 = vpop.eup %1717  ;;  %1213 = vperm.xlu0 %1713, %v1196_v54   ;;  %v1200_v15 = vmul.f32 %v1196_v54, %v1180_v55 }
 0x3ce   : > { %v1197_v63 = vmul.f32 %v1718_v20, %v1191_v58 }
 0x3cf   : > { %v1202_v26 = vsub.f32 %v1198_v31, %v1200_v15 }
 0x3d0   : > { %v1201_v11 = vmul.f32 %v1197_v63, %v1181_v8 }
 0x3d1   : > { %1218 = vperm.xlu0 %1713, %v1197_v63   ;;  %1227 = vperm.xlu1 %1714, %v1202_v26  }
 0x3d2   : > { %v1203_v12 = vsub.f32 %v1199_v5, %v1201_v11 }
 0x3d5   : > { %1232 = vperm.xlu1 %1714, %v1203_v12  }
 0x44c   : > { %v1214_v25 = vpop.permute.xlu0 %1213 }
 0x44d   : > { %v1221_v33 = vmul.f32 %v1214_v25, %v1207_v42  ;;  %v1222_v41 = vmul.f32 %v1214_v25, %v1208_v29 }
 0x450   : > { %v1219_v37 = vpop.permute.xlu0 %1218  ;;  %v1228_v50 = vpop.permute.xlu1 %1227 }
 0x451   : > { %v1235_v36 = vadd.f32 %v1228_v50, %v1221_v33  ;;  %v1236_v59 = vadd.f32 %v1228_v50, %v1222_v41  ;;  %v1223_v30 = vmul.f32 %v1219_v37, %v1209_v7  ;;  %v1224_v17 = vmul.f32 %v1219_v37, %v1210_v10 }
 0x453   : > { %vm1239_vm3 = vcmp.ge.f32.partialorder %v1235_v36, 0.0  ;;  %vm1240_vm1 = vcmp.ge.f32.partialorder %v1236_v59, 0.0  ;;  %v1243_v40 = vmul.f32 0.01, %v1235_v36  ;;  %v1244_v49 = vmul.f32 0.01, %v1236_v59 }
 0x454   : > { %v1233_v60 = vpop.permute.xlu1 %1232 }
 0x455   : > { %v1247_v16 = vsel %vm1239_vm3, %v1235_v36, %v1243_v40  ;;  %v1248_v34 = vsel %vm1240_vm1, %v1236_v59, %v1244_v49  ;;  %v1237_v48 = vadd.f32 %v1233_v60, %v1223_v30  ;;  %v1238_v47 = vadd.f32 %v1233_v60, %v1224_v17 }
 0x456   : > { %1251 = vst [vmem:[%s1862_s29] sm:$0xff] %v1247_v16  ;;  %1252 = vst [vmem:[%s1862_s29 + $0x8] sm:$0xff] %v1248_v34 }
 0x457   : > { %vm1241_vm12 = vcmp.ge.f32.partialorder %v1237_v48, 0.0  ;;  %vm1242_vm10 = vcmp.ge.f32.partialorder %v1238_v47, 0.0  ;;  %v1245_v57 = vmul.f32 0.01, %v1237_v48  ;;  %v1246_v44 = vmul.f32 0.01, %v1238_v47 }
 0x459   : > { %v1249_v53 = vsel %vm1241_vm12, %v1237_v48, %v1245_v57  ;;  %v1250_v3 = vsel %vm1242_vm10, %v1238_v47, %v1246_v44 }
 0x45a   : > { %1253 = vst [vmem:[%s1862_s29 + $0x10] sm:$0xff] %v1249_v53  ;;  %1254 = vst [vmem:[%s1862_s29 + $0x18] sm:$0xff] %v1250_v3 }
 0x45b PF: > { %s14_s19 = sadd.s32 1, %s1757_s19   ;;  %s2431_s15 = smov %s1749_s17 }
 0x45c   : > { %p11_p12 = scmp.ge.s32.totalorder %s14_s19, 6   ;;  %s2432_s16 = smov %s1753_s18 }
 0x45d   : > { %s2433_s17 = smov %s2436_s20  ;;  %s2434_s18 = smov %s2440_s21 }
 0x45e   :  { %13 = sbr.rel (!%p11_p12) target bundleno = 3 (0x3), region = 80 }

</bundles_post_ra>
